<compile_context>
chip_gen: v7x
topology: tpu7x:2x2x1
jax: 0.10.0
libtpu: 0.0.40
codegen_flags: <defaults>
</compile_context>

<pallas_src>
import functools
import math

import jax
import jax.numpy as jnp
from jax import lax
from jax.experimental import pallas as pl
from jax.experimental.pallas import tpu as pltpu

_LANE = 128
_MASK_VALUE = -1e30      # large finite negative; exp() underflows to exactly 0 in f32
_VMEM_LIMIT = 48 * 1024 * 1024   # raise v5e's 16 MiB default, headroom under v7x's 64 MiB

# Squeeze the size-1 batch dim out of the kernel refs (2-D tiles in-kernel).
_SQUEEZE_BATCH = pl.Squeezed() if hasattr(pl, "Squeezed") else None


def _round_up(x, m):
    return ((x + m - 1) // m) * m


def _qkv_proj_kernel(x_ref, w_ref, q_ref, k_ref, v_ref, *, d_out_p, compute_dtype):
    # Fused QKV projection: a single MXU matmul against wq|wk|wv (one RHS push,
    # N = 3*d_out_p fills the MXU columns far better than three d_out matmuls).
    # The 1/sqrt(d_out) scale is already folded into the Q weight columns.
    x = x_ref[...].astype(compute_dtype)                      # (blk_m, d_in_p)
    qkv = jnp.dot(x, w_ref[...], preferred_element_type=jnp.float32)
    q_ref[...] = qkv[:, :d_out_p].astype(q_ref.dtype)
    k_ref[...] = qkv[:, d_out_p:2 * d_out_p].astype(k_ref.dtype)
    v_ref[...] = qkv[:, 2 * d_out_p:].astype(v_ref.dtype)


def _flash_attn_kernel(q_ref, k_ref, v_ref, o_ref, m_sc, l_sc, acc_sc, *,
                       blk_q, blk_kv, compute_dtype):
    qi = pl.program_id(1)          # query-tile index  ("parallel")
    ki = pl.program_id(2)          # kv-tile index     ("arbitrary" reduction axis)

    @pl.when(ki == 0)
    def _init():
        m_sc[...] = jnp.full(m_sc.shape, -jnp.inf, dtype=jnp.float32)
        l_sc[...] = jnp.zeros(l_sc.shape, dtype=jnp.float32)
        acc_sc[...] = jnp.zeros(acc_sc.shape, dtype=jnp.float32)

    # Global token offsets of this (blk_q, blk_kv) tile.
    q_start = qi * blk_q
    k_start = ki * blk_kv
    q_end = q_start + (blk_q - 1)
    k_end = k_start + (blk_kv - 1)

    def _update(apply_causal_mask):
        q = q_ref[...]             # (blk_q, d_out_p), scale folded into weights
        k = k_ref[...]             # (blk_kv, d_out_p)
        # Q @ K^T by contracting the last dims of both: no K transpose is
        # materialized; the MXU consumes K with contraction on its minor dim.
        s = lax.dot_general(q, k, (((1,), (1,)), ((), ())),
                            preferred_element_type=jnp.float32)  # (blk_q, blk_kv) f32
        if apply_causal_mask:
            # Only diagonal-crossing blocks reach here; use global offsets so
            # block_q != block_kv is handled correctly.
            row = q_start + lax.broadcasted_iota(jnp.int32, (blk_q, blk_kv), 0)
            col = k_start + lax.broadcasted_iota(jnp.int32, (blk_q, blk_kv), 1)
            s = jnp.where(col > row, _MASK_VALUE, s)

        m_prev = m_sc[...]
        m_new = jnp.maximum(m_prev, jnp.max(s, axis=-1, keepdims=True))
        alpha = jnp.exp(m_prev - m_new)
        p = jnp.exp(s - m_new)
        l_sc[...] = alpha * l_sc[...] + jnp.sum(p, axis=-1, keepdims=True)
        acc_sc[...] = alpha * acc_sc[...] + jnp.dot(
            p.astype(compute_dtype), v_ref[...],
            preferred_element_type=jnp.float32)
        m_sc[...] = m_new

    # Causal block structure over (blk_q, blk_kv) tiles:
    #   k_end <= q_start                       : fully visible -> no mask work
    #   crosses the diagonal                   : iota mask (global offsets)
    #   k_start > q_end (above the diagonal)   : skipped entirely — no MXU/VPU
    #                                            work AND no DMA (index_map clamp)
    @pl.when(k_end <= q_start)
    def _full_block():
        _update(apply_causal_mask=False)

    @pl.when(jnp.logical_and(k_end > q_start, k_start <= q_end))
    def _diag_block():
        _update(apply_causal_mask=True)

    @pl.when(ki == pl.num_programs(2) - 1)
    def _finalize():
        # Flash-style: normalize the accumulator once; reciprocal on the EUP slot.
        inv_l = pl.reciprocal(l_sc[...], approx=True)
        o_ref[...] = (acc_sc[...] * inv_l).astype(o_ref.dtype)


def causal_attention(x, wq, wk, wv, *, compute_dtype=jnp.bfloat16,
                     block_q=256, block_kv=512):
    """Causal attention forward.

    x: (B, T, d_in); wq/wk/wv: (d_in, d_out) (transpose of nn.Linear weight).
    Returns (B, T, d_out) in x.dtype.
    block_q / block_kv: token tile sizes (256/512 keeps the KV stream off the
    HBM roofline on v5e/v6e/v7x while leaving >=2 parallel q-tiles for v7x's
    two TensorCores at moderate T*B).
    """
    B, T, d_in = x.shape
    d_out = wq.shape[1]
    q_scale = 1.0 / math.sqrt(d_out)     # uses the *unpadded* d_out, like PyTorch

    assert max(block_q, block_kv) % min(block_q, block_kv) == 0, (
        "block_q / block_kv must divide each other")

    # Lane-dense padding: last dims to multiples of 128, tokens to the tile size.
    d_in_p = _round_up(d_in, _LANE)
    d_out_p = _round_up(d_out, _LANE)
    t_p = _round_up(T, max(block_q, block_kv))

    x_p = jnp.pad(x, ((0, 0), (0, t_p - T), (0, d_in_p - d_in)))

    def _pad_w(w):
        return jnp.pad(w, ((0, d_in_p - d_in), (0, d_out_p - d_out)))

    # Fused + padded QKV weight in the MXU compute dtype; softmax scale folded
    # into the Q columns here (free: fuses with the pad/concat/cast).
    w_qkv = jnp.concatenate(
        [_pad_w(wq * q_scale), _pad_w(wk), _pad_w(wv)],
        axis=1).astype(compute_dtype)                         # (d_in_p, 3*d_out_p)

    # ---- Kernel 1: fused QKV projection over all B * t_p token rows. ----
    m_rows = B * t_p
    blk_m = max(block_q, block_kv)       # t_p (and thus m_rows) is a multiple of this
    x2d = x_p.reshape(m_rows, d_in_p)

    q2d, k2d, v2d = pl.pallas_call(
        functools.partial(_qkv_proj_kernel, d_out_p=d_out_p,
                          compute_dtype=compute_dtype),
        out_shape=[jax.ShapeDtypeStruct((m_rows, d_out_p), compute_dtype)] * 3,
        grid_spec=pltpu.PrefetchScalarGridSpec(
            num_scalar_prefetch=0,
            grid=(m_rows // blk_m,),
            in_specs=[
                pl.BlockSpec((blk_m, d_in_p), lambda i: (i, 0)),
                # Constant index map: weight is fetched once and stays resident.
                pl.BlockSpec((d_in_p, 3 * d_out_p), lambda i: (0, 0)),
            ],
            out_specs=[pl.BlockSpec((blk_m, d_out_p), lambda i: (i, 0))] * 3,
        ),
        compiler_params=pltpu.CompilerParams(
            dimension_semantics=("parallel",),
            vmem_limit_bytes=_VMEM_LIMIT),
    )(x2d, w_qkv)

    q = q2d.reshape(B, t_p, d_out_p)
    k = k2d.reshape(B, t_p, d_out_p)
    v = v2d.reshape(B, t_p, d_out_p)

    # ---- Kernel 2: flash-style causal attention. ----
    nq = t_p // block_q
    nk = t_p // block_kv

    def kv_index_map(b, qi, ki):
        # Clamp above-diagonal (fully masked) KV blocks to the last useful
        # block index so Pallas skips their DMA entirely (the pl.when skip in
        # the kernel already skips their compute).
        last_useful = (qi * block_q + block_q - 1) // block_kv
        return (b, jnp.minimum(ki, last_useful), 0)

    q_spec = pl.BlockSpec((_SQUEEZE_BATCH, block_q, d_out_p),
                          lambda b, qi, ki: (b, qi, 0))
    kv_spec = pl.BlockSpec((_SQUEEZE_BATCH, block_kv, d_out_p), kv_index_map)

    out_p = pl.pallas_call(
        functools.partial(_flash_attn_kernel, blk_q=block_q, blk_kv=block_kv,
                          compute_dtype=compute_dtype),
        out_shape=jax.ShapeDtypeStruct((B, t_p, d_out_p), x.dtype),
        grid_spec=pltpu.PrefetchScalarGridSpec(
            num_scalar_prefetch=0,
            grid=(B, nq, nk),                    # KV (reduction) axis last
            in_specs=[q_spec, kv_spec, kv_spec],
            out_specs=pl.BlockSpec((_SQUEEZE_BATCH, block_q, d_out_p),
                                   lambda b, qi, ki: (b, qi, 0)),
            scratch_shapes=[
                pltpu.VMEM((block_q, 1), jnp.float32),        # running max m
                pltpu.VMEM((block_q, 1), jnp.float32),        # running sum l
                pltpu.VMEM((block_q, d_out_p), jnp.float32),  # f32 accumulator
            ],
        ),
        compiler_params=pltpu.CompilerParams(
            dimension_semantics=("parallel", "parallel", "arbitrary"),
            vmem_limit_bytes=_VMEM_LIMIT),
    )(q, k, v)

    # Strip token / feature padding.
    return out_p[:, :T, :d_out]


def reference(x, wq, wk, wv):
    q = x @ wq
    k = x @ wk
    v = x @ wv
    scores = jnp.einsum("btd,bsd->bts", q, k)
    t = x.shape[1]
    mask = jnp.triu(jnp.ones((t, t), dtype=bool), k=1)
    scores = jnp.where(mask[None], -jnp.inf, scores)
    attn = jax.nn.softmax(scores / (wq.shape[1] ** 0.5), axis=-1)
    return attn @ v


if __name__ == "__main__":
    # Inputs matching the PyTorch script: 6 tokens, d_in=3, batch of 2 copies.
    inputs = jnp.array(
        [[0.43, 0.15, 0.89],
         [0.55, 0.87, 0.66],
         [0.57, 0.85, 0.64],
         [0.22, 0.58, 0.33],
         [0.77, 0.25, 0.10],
         [0.05, 0.80, 0.55]], dtype=jnp.float32)
    batch = jnp.stack((inputs, inputs), axis=0)          # (2, 6, 3)

    d_in = inputs.shape[1]      # 3
    d_out = 2

    # Deterministic params (PyTorch Linear style: U(-1/sqrt(d_in), 1/sqrt(d_in))),
    # stored as (d_in, d_out) == transpose of PyTorch's (d_out, d_in) weight.
    key = jax.random.PRNGKey(0)
    kq, kk, kv_key = jax.random.split(key, 3)
    bound = 1.0 / math.sqrt(d_in)
    wq = jax.random.uniform(kq, (d_in, d_out), jnp.float32, -bound, bound)
    wk = jax.random.uniform(kk, (d_in, d_out), jnp.float32, -bound, bound)
    wv = jax.random.uniform(kv_key, (d_in, d_out), jnp.float32, -bound, bound)

    ref = reference(batch, wq, wk, wv)

    # Default fast path: bf16 MXU operands, f32 accumulation + f32 softmax stats.
    out = jax.block_until_ready(causal_attention(batch, wq, wk, wv))
    assert out.shape == (2, 6, d_out)
    assert jnp.allclose(out, ref, atol=3e-2, rtol=3e-2), "bf16 path mismatch vs reference"

    # f32 operands for a tighter numerical check (tolerance covers the EUP
    # approximate reciprocal used for the softmax normalization).
    out_f32 = jax.block_until_ready(
        causal_attention(batch, wq, wk, wv, compute_dtype=jnp.float32))
    assert jnp.allclose(out_f32, ref, atol=5e-3, rtol=5e-3), "f32 path mismatch vs reference"

    print("KERNEL_OK")
</pallas_src>

<mosaic_0001>
module attributes {stable_mosaic.version = 11 : i64} {
  func.func @_qkv_proj_kernel(%arg0: i32, %arg1: memref<512x128xf32, #tpu.memory_space<vmem>>, %arg2: memref<128x384xbf16, #tpu.memory_space<vmem>>, %arg3: memref<512x128xbf16, #tpu.memory_space<vmem>>, %arg4: memref<512x128xbf16, #tpu.memory_space<vmem>>, %arg5: memref<512x128xbf16, #tpu.memory_space<vmem>>) attributes {dimension_semantics = [#tpu.dimension_semantics<parallel>], iteration_bounds = array<i64: 2>, scalar_prefetch = 0 : i64, scratch_operands = 0 : i64, tpu.core_type = #tpu.core_type<tc>, window_params = [{transform_indices = @transform_0, window_bounds = array<i64: 512, 128>}, {pipeline_mode = #tpu.pipeline_mode<synchronous>, transform_indices = @transform_1, window_bounds = array<i64: 128, 384>}, {transform_indices = @transform_2, window_bounds = array<i64: 512, 128>}, {transform_indices = @transform_3, window_bounds = array<i64: 512, 128>}, {transform_indices = @transform_4, window_bounds = array<i64: 512, 128>}]} {
    %c0 = arith.constant 0 : index
    %c0_0 = arith.constant 0 : index
    %0 = vector.load %arg1[%c0, %c0_0] : memref<512x128xf32, #tpu.memory_space<vmem>>, vector<512x128xf32>
    %1 = arith.truncf %0 : vector<512x128xf32> to vector<512x128xbf16>
    %c0_1 = arith.constant 0 : index
    %c0_2 = arith.constant 0 : index
    %2 = vector.load %arg2[%c0_1, %c0_2] : memref<128x384xbf16, #tpu.memory_space<vmem>>, vector<128x384xbf16>
    %cst = arith.constant dense<0.000000e+00> : vector<512x384xf32>
    %3 = tpu.matmul %1, %2, %cst {dimension_numbers = #tpu.dot_dimension_numbers<[1], [0], [0], [1], [0, 0, 1, 1], [], []>} : vector<512x128xbf16>, vector<128x384xbf16>, vector<512x384xf32> -> vector<512x384xf32>
    %4 = vector.extract_strided_slice %3 {offsets = [0, 0], sizes = [512, 128], strides = [1, 1]} : vector<512x384xf32> to vector<512x128xf32>
    %5 = arith.truncf %4 : vector<512x128xf32> to vector<512x128xbf16>
    %c0_3 = arith.constant 0 : index
    %c0_4 = arith.constant 0 : index
    %6 = vector.load %arg3[%c0_3, %c0_4] : memref<512x128xbf16, #tpu.memory_space<vmem>>, vector<512x128xbf16>
    tpu.vector_store %arg3[%c0_3, %c0_4], %5 {strides = array<i32>} : memref<512x128xbf16, #tpu.memory_space<vmem>>, vector<512x128xbf16>,
    %7 = vector.extract_strided_slice %3 {offsets = [0, 128], sizes = [512, 128], strides = [1, 1]} : vector<512x384xf32> to vector<512x128xf32>
    %8 = arith.truncf %7 : vector<512x128xf32> to vector<512x128xbf16>
    %c0_5 = arith.constant 0 : index
    %c0_6 = arith.constant 0 : index
    %9 = vector.load %arg4[%c0_5, %c0_6] : memref<512x128xbf16, #tpu.memory_space<vmem>>, vector<512x128xbf16>
    tpu.vector_store %arg4[%c0_5, %c0_6], %8 {strides = array<i32>} : memref<512x128xbf16, #tpu.memory_space<vmem>>, vector<512x128xbf16>,
    %10 = vector.extract_strided_slice %3 {offsets = [0, 256], sizes = [512, 128], strides = [1, 1]} : vector<512x384xf32> to vector<512x128xf32>
    %11 = arith.truncf %10 : vector<512x128xf32> to vector<512x128xbf16>
    %c0_7 = arith.constant 0 : index
    %c0_8 = arith.constant 0 : index
    %12 = vector.load %arg5[%c0_7, %c0_8] : memref<512x128xbf16, #tpu.memory_space<vmem>>, vector<512x128xbf16>
    tpu.vector_store %arg5[%c0_7, %c0_8], %11 {strides = array<i32>} : memref<512x128xbf16, #tpu.memory_space<vmem>>, vector<512x128xbf16>,
    return
  }
  func.func @transform_0(%arg0: i32) -> (i32, i32) {
    %c0_i32 = arith.constant 0 : i32
    %c0_i32_0 = arith.constant 0 : i32
    return %arg0, %c0_i32 : i32, i32
  }
  func.func @transform_1(%arg0: i32) -> (i32, i32) {
    %c0_i32 = arith.constant 0 : i32
    %c0_i32_0 = arith.constant 0 : i32
    %c0_i32_1 = arith.constant 0 : i32
    return %c0_i32, %c0_i32_0 : i32, i32
  }
  func.func @transform_2(%arg0: i32) -> (i32, i32) {
    %c0_i32 = arith.constant 0 : i32
    %c0_i32_0 = arith.constant 0 : i32
    return %arg0, %c0_i32 : i32, i32
  }
  func.func @transform_3(%arg0: i32) -> (i32, i32) {
    %c0_i32 = arith.constant 0 : i32
    %c0_i32_0 = arith.constant 0 : i32
    return %arg0, %c0_i32 : i32, i32
  }
  func.func @transform_4(%arg0: i32) -> (i32, i32) {
    %c0_i32 = arith.constant 0 : i32
    %c0_i32_0 = arith.constant 0 : i32
    return %arg0, %c0_i32 : i32, i32
  }
}

</mosaic_0001>

<bundles_post_ra>
// kernel: tpu_custom_call.1
= control target key start
LH: loop header
LB: loop body
LE: loop exit
PB: predicated region body
PF: predicated region fallthrough
CT: control target
= control target key end

     0   :  { %10 = vsyncpa [#allocation3], 0  ;;  %s4320_s0 = inlined_call_operand.hbm [shape: f32[1024,128], index: 0, kind: input, shape index: {}]   ;;  %s4321_s1 = inlined_call_operand.hbm [shape: bf16[128,384], index: 1, kind: input, shape index: {}]   ;;  %s4322_s2 = inlined_call_operand.hbm [shape: bf16[1024,128], index: 2, kind: output, shape index: {0}]   ;;  %s4323_s3 = inlined_call_operand.hbm [shape: bf16[1024,128], index: 3, kind: output, shape index: {1}]   ;;  %s4324_s4 = inlined_call_operand.hbm [shape: bf16[1024,128], index: 4, kind: output, shape index: {2}]  }
   0x1   :  { %12 = vsyncpa [#allocation3 + $0x1], 0 }
   0x2   :  { %13 = vsyncpa [#allocation6], 0 }
   0x3   :  { %14 = vsyncpa [#allocation4], 0 }
   0x4   :  { %16 = vsyncpa [#allocation4 + $0x1], 0 }
   0x5   :  { %17 = vsyncpa [#allocation9], 0 }
   0x6   :  { %19 = vsyncpa [#allocation9 + $0x1], 0  ;;  %s3790_s15 = smov 0   ;;  %s3792_s16 = smov 0  }
   0x7   :  { %s3794_s17 = smov 0   ;;  %s3796_s18 = smov 0  }
   0x8 LB: > { %s3811_s19 = sadd.s32 4294967295, %s3751_s18   ;;  %s4328_s20 = sadd.s32 4294967294, %s3751_s18   ;;  %s3751_s18 = sphi %s3796_s18, %s4347_s18   ;;  %s3747_s17 = sphi %s3794_s17, %s4346_s17   ;;  %s3743_s16 = sphi %s3792_s16, %s4345_s16   ;;  %s3739_s15 = sphi %s3790_s15, %s4344_s15  }
   0x9   : > { %p45_p0 = scmp.ne.s32.totalorder %s3743_s16, %s3739_s15  ;;  %p4325_p1 = scmp.eq.s32.totalorder %s3811_s19, 0 }
   0xa   : > { %p96_p3 = scmp.eq.s32.totalorder %s4328_s20, 1  ;;  %p2313_p5 = scmp.ge.s32.totalorder %s3751_s18, 1 }
   0xb   : > { %p3822_p4 = por %p4325_p1, %p45_p0  ;;  %p155_p7 = scmp.lt.s32.totalorder %s3751_s18, 3 }
   0xc   : > { %p3827_p6 = por %p96_p3, %p45_p0  ;;  %s3753_s24 = smov [#allocation5]  }
   0xd   : > { %s4329_s21 = scalar_select %p3822_p4, 1, 0 }
   0xe   : > { %s4330_s22 = scalar_select %p3827_p6, 1, 0 }
   0xf   : > { %p3832_p8 = pnand %p2313_p5, %p155_p7  ;;  %s167_s25 = sshll.u32 %s3753_s24, 4  ;;  %s3836_s25 = int_to_ptr.vmem [resolvable:$true] %s167_s25 }
  0x10   : > { %s3848_s27 = sadd.s32 1, %s3751_s18   ;;  %s32_s28 = sadd.s32 1, %s3747_s17 }
  0x11   : > { %s4331_s23 = scalar_select %p3832_p8, 1, 0 }
  0x12   : > { %p3469_p9 = pneg %p3832_p8  ;;  %s29_s29 = ssub.s32 %s3751_s18, %s3848_s27 }
  0x13   : > { %s3563_s6 = scalar_lea.hbm %s4321_s1, 3072 }
  0x14   : > { %p3843_p11 = pnand %p3469_p9, %p4325_p1  ;;  %p3564_p12 = scmp.ne.s32.totalorder %s4321_s1, %s3563_s6 }
  0x15   : > { %p3570_p5 = scmp.lt.u32.totalorder %s3563_s6, %s4321_s1 }
  0x16   : > { %p3565_p13 = pneg %p3843_p11 }
  0x18   : > { %p3566_p0 = pnand %p3565_p13, %p3564_p12 }
  0x1a   : > { %p3567_p3 = pneg %p3566_p0 }
  0x1c   : > { %p3572_p7 = pnand %p3570_p5, %p3567_p3 }
  0x1e   : > { %3575 = shalt.err (!%p3572_p7)
}
  0x1f   : > { %s3576_s11 = scalar_lea.vmem %s3836_s25, 3072  ;;  %p3584_p2 = scmp.lt.s32.totalorder %s3836_s25, %s3836_s25 }
  0x20   : > { %p3577_p9 = scmp.ne.s32.totalorder %s3836_s25, %s3576_s11  ;;  %p3585_p6 = scmp.lt.s32.totalorder %s3576_s11, %s3576_s11 }
  0x22   : > { %p3579_p10 = pnand %p3577_p9, %p3565_p13  ;;  %p3586_p4 = por %p3585_p6, %p3584_p2 }
  0x24   : > { %p3580_p1 = pneg %p3579_p10 }
  0x26   : > { %p3587_p8 = pnand %p3586_p4, %p3580_p1 }
  0x28   : > { %3590 = shalt.err (!%p3587_p8)
}
  0x29   : > { %s3754_s12 = smov 192   ;;  %s3755_s13 = smov 12  }
  0x2a   : > { %3472 = dma.hbm_to_vmem [thread:$0]  (!%p3843_p11), %s4321_s1, 3072, %s3836_s25, [#allocation6], %s3754_s12, %s3754_s12, %s3755_s13  }
  0x2b   : > { %p30_p2 = scmp.eq.s32.totalorder %s29_s29, 0  ;;  %p39_p1 = scmp.ne.s32.totalorder %s3747_s17, %s3743_s16 }
  0x2c   : > { %p40_p4 = scmp.eq.s32.totalorder %s3751_s18, 0  ;;  %p3488_p6 = scmp.lt.s32.totalorder %s3751_s18, 2 }
  0x2d   : > { %s3879_s30 = scalar_select %p30_p2, %s3747_s17, %s32_s28  }
  0x2e   : > { %p41_p8 = por %p40_p4, %p39_p1  ;;  %p4333_p10 = scmp.eq.s32.totalorder %s3811_s19, 1 }
  0x2f   : > { %s181_s6 = sand.u32 1, %s3747_s17   ;;  %s2552_s7 = sshll.u32 %s3751_s18, 13 }
  0x30   : > { %p3883_p12 = por %p4333_p10, %p39_p1  ;;  %s2316_s8 = sshll.u32 %s181_s6, 9 }
  0x31   : > { %s3892_s10 = scalar_lea.hbm %s4320_s0, %s2552_s7  ;;  %s185_s25 = scalar_lea.vmem [#allocation2], %s2316_s8 }
  0x32   : > { %s192_s28 = sshll.u32 %s185_s25, 4  ;;  %p3894_p11 = pnand %p3488_p6, %p41_p8  ;;  %s3898_s28 = int_to_ptr.vmem [resolvable:$true] %s192_s28 }
  0x33   : > { %s3900_s11 = scalar_lea.sflag [#allocation3], %s181_s6  ;;  %s3591_s12 = scalar_lea.hbm %s3892_s10, 8192 }
  0x34   : > { %p3592_p13 = scmp.ne.s32.totalorder %s3892_s10, %s3591_s12  ;;  %p3593_p0 = pneg %p3894_p11 }
  0x35   : > { %s3596_s24 = scalar_lea.hbm %s4320_s0, 16384  ;;  %p3597_p7 = scmp.lt.u32.totalorder %s3892_s10, %s4320_s0 }
  0x36   : > { %p3594_p3 = pnand %p3593_p0, %p3592_p13  ;;  %p3598_p9 = scmp.lt.u32.totalorder %s3596_s24, %s3591_s12 }
  0x37   : > { %p3600_p1 = scmp.lt.u32.totalorder %s3591_s12, %s3892_s10 }
  0x38   : > { %p3595_p5 = pneg %p3594_p3  ;;  %p3599_p2 = por %p3598_p9, %p3597_p7 }
  0x3a   : > { %p3601_p4 = por %p3600_p1, %p3599_p2 }
  0x3c   : > { %p3602_p6 = pnand %p3601_p4, %p3595_p5 }
  0x3e   : > { %3605 = shalt.err (!%p3602_p6)
}
  0x3f   : > { %s3606_s6 = scalar_lea.vmem %s3898_s28, 8192  ;;  %s3756_s26 = smov [#allocation2]  }
  0x40   : > { %p3607_p8 = scmp.ne.s32.totalorder %s3898_s28, %s3606_s6  ;;  %s3611_s9 = sshll.u32 %s3756_s26, 4  ;;  %s3612_s9 = int_to_ptr.vmem [resolvable:$false] %s3611_s9 }
  0x41   : > { %s3613_s25 = scalar_lea.vmem %s3612_s9, 16384  ;;  %p3614_p3 = scmp.lt.s32.totalorder %s3898_s28, %s3612_s9 }
  0x42   : > { %p3609_p10 = pnand %p3607_p8, %p3593_p0  ;;  %p3615_p7 = scmp.lt.s32.totalorder %s3613_s25, %s3606_s6 }
  0x44   : > { %p3610_p13 = pneg %p3609_p10  ;;  %p3616_p9 = por %p3615_p7, %p3614_p3 }
  0x46   : > { %p3617_p2 = pnand %p3616_p9, %p3610_p13 }
  0x48   : > { %3620 = shalt.err (!%p3617_p2)
}
  0x49   : > { %s3757_s12 = smov 128   ;;  %s3758_s13 = smov 8  }
  0x4a   : > { %3476 = dma.hbm_to_vmem [thread:$0]  (!%p3894_p11), %s3892_s10, 8192, %s3898_s28, %s3900_s11, %s3757_s12, %s3757_s12, %s3758_s13  }
  0x4b   : > { %p4336_p0 = scmp.ne.s32.totalorder %s4331_s23, 0 }
  0x4c   : > { %s3931_s14 = sand.u32 (!%p4336_p0), 1, %s3743_s16   ;;  %p4337_p5 = scmp.ne.s32.totalorder (!%p4336_p0), %s4329_s21, 0 }
  0x4d   : > { %204 = sbr.rel (%p4336_p0) target bundleno = 589 (0x24d), region = 28  ;;  %s2320_s24 = sshll.u32 (!%p4336_p0), %s3931_s14, 9 }
  0x4e   : > { %s207_s7 = scalar_lea.sflag (!%p4336_p0), [#allocation3], %s3931_s14  ;;  %s3935_s8 = scalar_lea.vmem (!%p4336_p0), [#allocation2], %s2320_s24 }
  0x54   : > { %3722 = dma.done.wait (%p4337_p5), %s207_s7, 8192  }
  0x55   : > { %3724 = vsyncadd (%p4337_p5), %s207_s7, 4294959104  ;;  %p4338_p11 = scmp.eq.s32.totalorder %s3811_s19, 0 }
  0x57   : > { %3726 = dma.done.wait (%p4338_p11), [#allocation6], 3072   ;;  %p4339_p1 = pmov %p4338_p11 }
  0x58   : > { %v3759_v0 = vmov 0   ;;  %v3531_v1 = vld [vmem:[#allocation5 + $0x4] ss:$12 sps:$4 sm:$0xff]   ;;  %v3533_v2 = vld [vmem:[#allocation5] ss:$12 sps:$4 sm:$0xff]   ;;  %v257_v26 = vld [vmem:[%s3935_s8 + $0x18] sm:$0xff] }
  0x59   : > { %3728 = vsyncadd (%p4339_p1), [#allocation6], 4294964224  ;;  %542 = vmatprep.mubr.bf16.mxu0 %v3759_v0  ;;  %782 = vmatprep.mubr.bf16.mxu1 %v3759_v0  ;;  %v3534_v3 = vld [vmem:[#allocation5 + $0x1c] ss:$12 sps:$4 sm:$0xff]   ;;  %v3536_v4 = vld [vmem:[#allocation5 + $0x18] ss:$12 sps:$4 sm:$0xff]  }
  0x5a   : > { %510 = vmatprep.subr.bf16.mxu0 %v3531_v1  ;;  %3441 = vmatprep.subr.bf16.mxu1 %v3531_v1  ;;  %v3537_v5 = vld [vmem:[#allocation5 + $0x34] ss:$12 sps:$4 sm:$0xff]   ;;  %v3539_v6 = vld [vmem:[#allocation5 + $0x30] ss:$12 sps:$4 sm:$0xff]   ;;  %v3540_v7 = vld [vmem:[#allocation5 + $0x4c] ss:$12 sps:$4 sm:$0xff]  }
  0x5b   : > { %511 = vmatpush1.bf16.msra.mxu0 %v3533_v2  ;;  %3449 = vmatpush1.bf16.msra.mxu1 %v3533_v2  ;;  %v3542_v8 = vld [vmem:[#allocation5 + $0x48] ss:$12 sps:$4 sm:$0xff]   ;;  %v3543_v9 = vld [vmem:[#allocation5 + $0x64] ss:$12 sps:$4 sm:$0xff]   ;;  %v3545_v10 = vld [vmem:[#allocation5 + $0x60] ss:$12 sps:$4 sm:$0xff]  }
  0x5c   : > { %512 = vmatprep.subr.bf16.mxu0 %v3534_v3  ;;  %3442 = vmatprep.subr.bf16.mxu1 %v3534_v3  ;;  %v3546_v11 = vld [vmem:[#allocation5 + $0x7c] ss:$12 sps:$4 sm:$0xff]   ;;  %v3548_v12 = vld [vmem:[#allocation5 + $0x78] ss:$12 sps:$4 sm:$0xff]   ;;  %v3549_v13 = vld [vmem:[#allocation5 + $0x94] ss:$12 sps:$4 sm:$0xff]  }
  0x5d   : > { %v3551_v14 = vld [vmem:[#allocation5 + $0x90] ss:$12 sps:$4 sm:$0xff]   ;;  %v3552_v15 = vld [vmem:[#allocation5 + $0xac] ss:$12 sps:$4 sm:$0xff]   ;;  %v3554_v16 = vld [vmem:[#allocation5 + $0xa8] ss:$12 sps:$4 sm:$0xff]  }
  0x5e   : > { %v254_v17 = vld [vmem:[%s3935_s8] sm:$0xff]  ;;  %v255_v18 = vld [vmem:[%s3935_s8 + $0x8] sm:$0xff]  ;;  %v256_v25 = vld [vmem:[%s3935_s8 + $0x10] sm:$0xff]  ;;  %s4086_s21 = sshll.u32 %s3931_s14, 8  ;;  %s2745_s11 = sshll.u32 %s3811_s19, 12 }
  0x5f   : > { %513 = vmatpush1.bf16.msra.mxu0 %v3536_v4  ;;  %3450 = vmatpush1.bf16.msra.mxu1 %v3536_v4  ;;  %v302_v19 = vld [vmem:[%s3935_s8 + $0x180] sm:$0xff]  ;;  %v303_v20 = vld [vmem:[%s3935_s8 + $0x188] sm:$0xff]  ;;  %v3951_v22 = vpack.c.bf16 %v255_v18, %v254_v17  ;;  %v304_v27 = vld [vmem:[%s3935_s8 + $0x190] sm:$0xff]  ;;  %v3963_v30 = vpack.c.bf16 %v257_v26, %v256_v25  ;;  %s4089_s23 = scalar_lea.vmem [#allocation7], %s4086_s21  ;;  %s4094_s10 = scalar_lea.vmem [#allocation8], %s4086_s21 }
  0x60   : > { %514 = vmatprep.subr.bf16.mxu0 %v3537_v5  ;;  %3443 = vmatprep.subr.bf16.mxu1 %v3537_v5  ;;  %v3555_v21 = vld [vmem:[#allocation5 + $0x8] ss:$12 sps:$4 sm:$0xff]   ;;  %v3953_v23 = vpack.c.bf16 %v303_v20, %v302_v19  ;;  %v3556_v24 = vld [vmem:[#allocation5 + $0x20] ss:$12 sps:$4 sm:$0xff]   ;;  %v305_v28 = vld [vmem:[%s3935_s8 + $0x198] sm:$0xff]  ;;  %s4128_s28 = scalar_lea.vmem [#allocation10], %s4086_s21  ;;  %s4197_s13 = scalar_lea.hbm %s4322_s2, %s2745_s11 }
  0x61   : > { %v3557_v29 = vld [vmem:[#allocation5 + $0x38] ss:$12 sps:$4 sm:$0xff]   ;;  %v3965_v31 = vpack.c.bf16 %v305_v28, %v304_v27  ;;  %v3558_v32 = vld [vmem:[#allocation5 + $0x50] ss:$12 sps:$4 sm:$0xff]   ;;  %v259_v34 = vld [vmem:[%s3935_s8 + $0x28] sm:$0xff]  ;;  %s2136_s6 = sshll.u32 %s4089_s23, 4  ;;  %s4213_s12 = scalar_lea.hbm %s4324_s4, %s2745_s11  ;;  %s4199_s6 = int_to_ptr.vmem [resolvable:$true] %s2136_s6 }
  0x62   : > { %v258_v33 = vld [vmem:[%s3935_s8 + $0x20] sm:$0xff]  ;;  %v307_v36 = vld [vmem:[%s3935_s8 + $0x1a8] sm:$0xff]  ;;  %v260_v41 = vld [vmem:[%s3935_s8 + $0x30] sm:$0xff]  ;;  %s2152_s26 = sshll.u32 %s4094_s10, 4  ;;  %s2168_s9 = sshll.u32 %s4128_s28, 4  ;;  %s4206_s26 = int_to_ptr.vmem [resolvable:$true] %s2152_s26  ;;  %s4215_s9 = int_to_ptr.vmem [resolvable:$true] %s2168_s9 }
  0x63   : > { %515 = vmatpush1.bf16.msra.mxu0 %v3539_v6  ;;  %3451 = vmatpush1.bf16.msra.mxu1 %v3539_v6  ;;  %v306_v35 = vld [vmem:[%s3935_s8 + $0x1a0] sm:$0xff]  ;;  %v3559_v37 = vld [vmem:[#allocation5 + $0x68] ss:$12 sps:$4 sm:$0xff]   ;;  %v3975_v38 = vpack.c.bf16 %v259_v34, %v258_v33  ;;  %v261_v42 = vld [vmem:[%s3935_s8 + $0x38] sm:$0xff]  ;;  %s2113_s20 = scalar_lea.sflag [#allocation4], %s3931_s14  ;;  %s3621_s29 = scalar_lea.vmem %s4199_s6, 4096 }
  0x64   : > { %516 = vmatprep.subr.bf16.mxu0 %v3540_v7  ;;  %3444 = vmatprep.subr.bf16.mxu1 %v3540_v7  ;;  %v3977_v39 = vpack.c.bf16 %v307_v36, %v306_v35  ;;  %v3560_v40 = vld [vmem:[#allocation5 + $0x80] ss:$12 sps:$4 sm:$0xff]   ;;  %v308_v43 = vld [vmem:[%s3935_s8 + $0x1b0] sm:$0xff]  ;;  %v309_v44 = vld [vmem:[%s3935_s8 + $0x1b8] sm:$0xff]  ;;  %v321_v46 = vpack.c.bf16 %v261_v42, %v260_v41  ;;  %p3622_p4 = scmp.ne.s32.totalorder %s4199_s6, %s3621_s29  ;;  %s3760_s24 = smov [#allocation7]  }
  0x65   : > { %v3561_v45 = vld [vmem:[#allocation5 + $0x98] ss:$12 sps:$4 sm:$0xff]   ;;  %v3987_v47 = vpack.c.bf16 %v309_v44, %v308_v43  ;;  %v3562_v48 = vld [vmem:[#allocation5 + $0xb0] ss:$12 sps:$4 sm:$0xff]   ;;  %v263_v50 = vld [vmem:[%s3935_s8 + $0x48] sm:$0xff]  ;;  %s3625_s7 = sshll.u32 %s3760_s24, 4  ;;  %s3626_s7 = int_to_ptr.vmem [resolvable:$false] %s3625_s7 }
  0x66   : > { %v262_v49 = vld [vmem:[%s3935_s8 + $0x40] sm:$0xff]  ;;  %v311_v52 = vld [vmem:[%s3935_s8 + $0x1c8] sm:$0xff]  ;;  %v264_v55 = vld [vmem:[%s3935_s8 + $0x50] sm:$0xff]  ;;  %p3623_p6 = pnand %p3622_p4, %p3883_p12  ;;  %p3628_p10 = scmp.lt.s32.totalorder %s4199_s6, %s3626_s7 }
  0x67   : > { %517 = vmatpush1.bf16.msra.mxu0 %v3542_v8  ;;  %3452 = vmatpush1.bf16.msra.mxu1 %v3542_v8  ;;  %v310_v51 = vld [vmem:[%s3935_s8 + $0x1c0] sm:$0xff]  ;;  %v322_v53 = vpack.c.bf16 %v263_v50, %v262_v49  ;;  %v265_v56 = vld [vmem:[%s3935_s8 + $0x58] sm:$0xff]  ;;  %v312_v57 = vld [vmem:[%s3935_s8 + $0x1d0] sm:$0xff] }
  0x68   : > { %518 = vmatprep.subr.bf16.mxu0 %v3543_v9  ;;  %3445 = vmatprep.subr.bf16.mxu1 %v3543_v9  ;;  %v3996_v54 = vpack.c.bf16 %v311_v52, %v310_v51  ;;  %v313_v58 = vld [vmem:[%s3935_s8 + $0x1d8] sm:$0xff]  ;;  %v323_v59 = vpack.c.bf16 %v265_v56, %v264_v55  ;;  %v266_v61 = vld [vmem:[%s3935_s8 + $0x60] sm:$0xff]  ;;  %v267_v62 = vld [vmem:[%s3935_s8 + $0x68] sm:$0xff]  ;;  %p3624_p8 = pneg %p3623_p6 }
  0x69   : > { %v4005_v60 = vpack.c.bf16 %v313_v58, %v312_v57  ;;  %v314_v63 = vld [vmem:[%s3935_s8 + $0x1e0] sm:$0xff]  ;;  %v315_v1 = vld [vmem:[%s3935_s8 + $0x1e8] sm:$0xff]  ;;  %v324_v2 = vpack.c.bf16 %v267_v62, %v266_v61  ;;  %v268_v4 = vld [vmem:[%s3935_s8 + $0x70] sm:$0xff] }
  0x6a   : > { %v4014_v3 = vpack.c.bf16 %v315_v1, %v314_v63  ;;  %v269_v5 = vld [vmem:[%s3935_s8 + $0x78] sm:$0xff]  ;;  %v316_v6 = vld [vmem:[%s3935_s8 + $0x1f0] sm:$0xff]  ;;  %v275_v17 = vld [vmem:[%s3935_s8 + $0xa8] sm:$0xff] }
  0x6b   : > { %519 = vmatpush1.bf16.msra.mxu0 %v3545_v10  ;;  %3453 = vmatpush1.bf16.msra.mxu1 %v3545_v10  ;;  %v317_v7 = vld [vmem:[%s3935_s8 + $0x1f8] sm:$0xff]  ;;  %v325_v8 = vpack.c.bf16 %v269_v5, %v268_v4  ;;  %v270_v10 = vld [vmem:[%s3935_s8 + $0x80] sm:$0xff]  ;;  %v276_v19 = vld [vmem:[%s3935_s8 + $0xb0] sm:$0xff] }
  0x6c   : > { %520 = vmatprep.subr.bf16.mxu0 %v3546_v11  ;;  %3446 = vmatprep.subr.bf16.mxu1 %v3546_v11  ;;  %v4023_v9 = vpack.c.bf16 %v317_v7, %v316_v6  ;;  %v271_v11 = vld [vmem:[%s3935_s8 + $0x88] sm:$0xff]  ;;  %v277_v20 = vld [vmem:[%s3935_s8 + $0xb8] sm:$0xff]  ;;  %v280_v26 = vld [vmem:[%s3935_s8 + $0xd0] sm:$0xff] }
  0x6d   : > { %v281_v27 = vld [vmem:[%s3935_s8 + $0xd8] sm:$0xff]  ;;  %v284_v33 = vld [vmem:[%s3935_s8 + $0xf0] sm:$0xff]  ;;  %v286_v35 = vld [vmem:[%s3935_s8 + $0x100] sm:$0xff] }
  0x6e   : > { %v331_v28 = vpack.c.bf16 %v281_v27, %v280_v26  ;;  %v285_v34 = vld [vmem:[%s3935_s8 + $0xf8] sm:$0xff]  ;;  %v287_v36 = vld [vmem:[%s3935_s8 + $0x108] sm:$0xff]  ;;  %v290_v42 = vld [vmem:[%s3935_s8 + $0x120] sm:$0xff] }
  0x6f   : > { %521 = vmatpush1.bf16.msra.mxu0 %v3548_v12  ;;  %3454 = vmatpush1.bf16.msra.mxu1 %v3548_v12  ;;  %v326_v12 = vpack.c.bf16 %v271_v11, %v270_v10  ;;  %v289_v41 = vld [vmem:[%s3935_s8 + $0x118] sm:$0xff]  ;;  %v291_v43 = vld [vmem:[%s3935_s8 + $0x128] sm:$0xff]  ;;  %v294_v49 = vld [vmem:[%s3935_s8 + $0x140] sm:$0xff] }
  0x70   : > { %522 = vmatprep.subr.bf16.mxu0 %v3549_v13  ;;  %3447 = vmatprep.subr.bf16.mxu1 %v3549_v13  ;;  %v272_v13 = vld [vmem:[%s3935_s8 + $0x90] sm:$0xff]  ;;  %v295_v50 = vld [vmem:[%s3935_s8 + $0x148] sm:$0xff]  ;;  %v297_v55 = vld [vmem:[%s3935_s8 + $0x158] sm:$0xff] }
  0x71   : > { %v338_v52 = vpack.c.bf16 %v295_v50, %v294_v49  ;;  %v298_v56 = vld [vmem:[%s3935_s8 + $0x160] sm:$0xff]  ;;  %v299_v57 = vld [vmem:[%s3935_s8 + $0x168] sm:$0xff]  ;;  %v300_v61 = vld [vmem:[%s3935_s8 + $0x170] sm:$0xff] }
  0x72   : > { %v301_v62 = vld [vmem:[%s3935_s8 + $0x178] sm:$0xff] }
  0x73   : > { %523 = vmatpush1.bf16.msra.mxu0 %v3551_v14  ;;  %3455 = vmatpush1.bf16.msra.mxu1 %v3551_v14  ;;  %v273_v14 = vld [vmem:[%s3935_s8 + $0x98] sm:$0xff]  ;;  %v341_v63 = vpack.c.bf16 %v301_v62, %v300_v61 }
  0x74   : > { %524 = vmatprep.subr.bf16.mxu0 %v3552_v15  ;;  %3448 = vmatprep.subr.bf16.mxu1 %v3552_v15  ;;  %v327_v15 = vpack.c.bf16 %v273_v14, %v272_v13 }
  0x77   : > { %525 = vmatpush1.bf16.msra.mxu0 %v3554_v16  ;;  %3456 = vmatpush1.bf16.msra.mxu1 %v3554_v16  ;;  %v274_v16 = vld [vmem:[%s3935_s8 + $0xa0] sm:$0xff] }
  0x78   : > { %3361 = vmatprep.subr.bf16.mxu1 %v3555_v21  ;;  %v328_v18 = vpack.c.bf16 %v275_v17, %v274_v16 }
  0x7a   : > { %543 = vmatmul.mubr.bf16.vlgmr.msra.gmra.mrb[0].mxu0 %v3951_v22  ;;  %783 = vmatmul.mubr.bf16.vlgmr.msra.gmra.mrb[0].mxu1 %v3953_v23 }
  0x7b   : > { %3362 = vmatpush3.bf16.msra.mxu1 %v3555_v21  ;;  %552 = vmatprep.mubr.bf16.mxu0 %v3759_v0  ;;  %v329_v21 = vpack.c.bf16 %v277_v20, %v276_v19 }
  0x7c   : > { %792 = vmatprep.mubr.bf16.mxu1 %v3759_v0  ;;  %3363 = vmatprep.subr.bf16.mxu1 %v3556_v24 }
  0x7f   : > { %3364 = vmatpush3.bf16.msra.mxu1 %v3556_v24  ;;  %v279_v24 = vld [vmem:[%s3935_s8 + $0xc8] sm:$0xff] }
  0x80   : > { %3365 = vmatprep.subr.bf16.mxu1 %v3557_v29 }
  0x82   : > { %553 = vmatmul.mubr.bf16.gmra.mrb[4].mxu0 %v3963_v30  ;;  %793 = vmatmul.mubr.bf16.gmra.mrb[4].mxu1 %v3965_v31 }
  0x83   : > { %562 = vmatprep.mubr.bf16.mxu0 %v3759_v0  ;;  %802 = vmatprep.mubr.bf16.mxu1 %v3759_v0 }
  0x84   : > { %3366 = vmatpush3.bf16.msra.mxu1 %v3557_v29  ;;  %v282_v29 = vld [vmem:[%s3935_s8 + $0xe0] sm:$0xff] }
  0x85   : > { %3367 = vmatprep.subr.bf16.mxu1 %v3558_v32 }
  0x88   : > { %3368 = vmatpush3.bf16.msra.mxu1 %v3558_v32 }
  0x89   : > { %3369 = vmatprep.subr.bf16.mxu1 %v3559_v37 }
  0x8a   : > { %563 = vmatmul.mubr.bf16.gmra.mrb[8].mxu0 %v3975_v38  ;;  %803 = vmatmul.mubr.bf16.gmra.mrb[8].mxu1 %v3977_v39 }
  0x8b   : > { %572 = vmatprep.mubr.bf16.mxu0 %v3759_v0  ;;  %812 = vmatprep.mubr.bf16.mxu1 %v3759_v0 }
  0x8c   : > { %3370 = vmatpush3.bf16.msra.mxu1 %v3559_v37  ;;  %v333_v37 = vpack.c.bf16 %v285_v34, %v284_v33 }
  0x8d   : > { %3371 = vmatprep.subr.bf16.mxu1 %v3560_v40 }
  0x90   : > { %3372 = vmatpush3.bf16.msra.mxu1 %v3560_v40  ;;  %v288_v40 = vld [vmem:[%s3935_s8 + $0x110] sm:$0xff] }
  0x91   : > { %3373 = vmatprep.subr.bf16.mxu1 %v3561_v45  ;;  %v335_v44 = vpack.c.bf16 %v289_v41, %v288_v40 }
  0x92   : > { %573 = vmatmul.mubr.bf16.gmra.mrb[12].mxu0 %v321_v46  ;;  %813 = vmatmul.mubr.bf16.gmra.mrb[12].mxu1 %v3987_v47 }
  0x93   : > { %582 = vmatprep.mubr.bf16.mxu0 %v3759_v0  ;;  %822 = vmatprep.mubr.bf16.mxu1 %v3759_v0 }
  0x94   : > { %3374 = vmatpush3.bf16.msra.mxu1 %v3561_v45  ;;  %v336_v45 = vpack.c.bf16 %v291_v43, %v290_v42 }
  0x95   : > { %3375 = vmatprep.subr.bf16.mxu1 %v3562_v48 }
  0x98   : > { %3376 = vmatpush3.bf16.msra.mxu1 %v3562_v48  ;;  %v293_v48 = vld [vmem:[%s3935_s8 + $0x138] sm:$0xff] }
  0x9a   : > { %583 = vmatmul.mubr.bf16.gmra.mrb[16].mxu0 %v322_v53  ;;  %823 = vmatmul.mubr.bf16.gmra.mrb[16].mxu1 %v3996_v54 }
  0x9b   : > { %592 = vmatprep.mubr.bf16.mxu0 %v3759_v0  ;;  %832 = vmatprep.mubr.bf16.mxu1 %v3759_v0 }
  0xa2   : > { %593 = vmatmul.mubr.bf16.gmra.mrb[20].mxu0 %v323_v59  ;;  %833 = vmatmul.mubr.bf16.gmra.mrb[20].mxu1 %v4005_v60 }
  0xa3   : > { %602 = vmatprep.mubr.bf16.mxu0 %v3759_v0  ;;  %842 = vmatprep.mubr.bf16.mxu1 %v3759_v0 }
  0xaa   : > { %603 = vmatmul.mubr.bf16.gmra.mrb[24].mxu0 %v324_v2  ;;  %843 = vmatmul.mubr.bf16.gmra.mrb[24].mxu1 %v4014_v3 }
  0xab   : > { %612 = vmatprep.mubr.bf16.mxu0 %v3759_v0  ;;  %852 = vmatprep.mubr.bf16.mxu1 %v3759_v0 }
  0xb2   : > { %613 = vmatmul.mubr.bf16.gmra.mrb[28].mxu0 %v325_v8  ;;  %853 = vmatmul.mubr.bf16.gmra.mrb[28].mxu1 %v4023_v9 }
  0xb3   : > { %622 = vmatprep.mubr.bf16.mxu0 %v3759_v0  ;;  %3377 = vmatprep.mubr.bf16.mxu1 %v3951_v22  ;;  %v278_v22 = vld [vmem:[%s3935_s8 + $0xc0] sm:$0xff] }
  0xb4   : > { %v330_v25 = vpack.c.bf16 %v279_v24, %v278_v22 }
  0xba   : > { %623 = vmatmul.mubr.bf16.gmra.mrb[32].mxu0 %v326_v12  ;;  %3378 = vmatmul.mubr.bf16.vlgmr.msra.gmra.mrb[32].mxu1 %v3963_v30  ;;  %v283_v30 = vld [vmem:[%s3935_s8 + $0xe8] sm:$0xff] }
  0xbb   : > { %632 = vmatprep.mubr.bf16.mxu0 %v3759_v0  ;;  %3381 = vmatprep.mubr.bf16.mxu1 %v3975_v38  ;;  %v332_v32 = vpack.c.bf16 %v283_v30, %v282_v29  ;;  %v334_v38 = vpack.c.bf16 %v287_v36, %v286_v35 }
  0xc2   : > { %633 = vmatmul.mubr.bf16.gmra.mrb[36].mxu0 %v327_v15  ;;  %3382 = vmatmul.mubr.bf16.gmra.mrb[36].mxu1 %v321_v46  ;;  %v292_v46 = vld [vmem:[%s3935_s8 + $0x130] sm:$0xff] }
  0xc3   : > { %642 = vmatprep.mubr.bf16.mxu0 %v3759_v0  ;;  %3385 = vmatprep.mubr.bf16.mxu1 %v322_v53  ;;  %v337_v51 = vpack.c.bf16 %v293_v48, %v292_v46  ;;  %v296_v53 = vld [vmem:[%s3935_s8 + $0x150] sm:$0xff]  ;;  %s4204_s8 = scalar_lea.hbm %s4323_s3, %s2745_s11 }
  0xc4   : > { %v339_v58 = vpack.c.bf16 %v297_v55, %v296_v53 }
  0xca   : > { %643 = vmatmul.mubr.bf16.gmra.mrb[40].mxu0 %v328_v18  ;;  %3386 = vmatmul.mubr.bf16.gmra.mrb[40].mxu1 %v323_v59  ;;  %v340_v59 = vpack.c.bf16 %v299_v57, %v298_v56 }
  0xcb   : > { %652 = vmatprep.mubr.bf16.mxu0 %v3759_v0  ;;  %3389 = vmatprep.mubr.bf16.mxu1 %v324_v2 }
  0xd2   : > { %653 = vmatmul.mubr.bf16.gmra.mrb[44].mxu0 %v329_v21  ;;  %3390 = vmatmul.mubr.bf16.gmra.mrb[44].mxu1 %v325_v8 }
  0xd3   : > { %662 = vmatprep.mubr.bf16.mxu0 %v3759_v0  ;;  %3393 = vmatprep.mubr.bf16.mxu1 %v326_v12 }
  0xda   : > { %663 = vmatmul.mubr.bf16.gmra.mrb[48].mxu0 %v330_v25  ;;  %3394 = vmatmul.mubr.bf16.gmra.mrb[48].mxu1 %v327_v15 }
  0xdb   : > { %672 = vmatprep.mubr.bf16.mxu0 %v3759_v0  ;;  %3397 = vmatprep.mubr.bf16.mxu1 %v328_v18 }
  0xe2   : > { %673 = vmatmul.mubr.bf16.gmra.mrb[52].mxu0 %v331_v28  ;;  %3398 = vmatmul.mubr.bf16.gmra.mrb[52].mxu1 %v329_v21 }
  0xe3   : > { %682 = vmatprep.mubr.bf16.mxu0 %v3759_v0  ;;  %3401 = vmatprep.mubr.bf16.mxu1 %v330_v25 }
  0xea   : > { %683 = vmatmul.mubr.bf16.gmra.mrb[56].mxu0 %v332_v32  ;;  %3402 = vmatmul.mubr.bf16.gmra.mrb[56].mxu1 %v331_v28 }
  0xeb   : > { %692 = vmatprep.mubr.bf16.mxu0 %v3759_v0  ;;  %3405 = vmatprep.mubr.bf16.mxu1 %v332_v32 }
  0xf2   : > { %693 = vmatmul.mubr.bf16.gmra.mrb[60].mxu0 %v333_v37  ;;  %3406 = vmatmul.mubr.bf16.gmra.mrb[60].mxu1 %v333_v37 }
  0xf3   : > { %702 = vmatprep.mubr.bf16.mxu0 %v3759_v0  ;;  %3409 = vmatprep.mubr.bf16.mxu1 %v334_v38 }
  0xfa   : > { %703 = vmatmul.mubr.bf16.gmra.mrb[64].mxu0 %v334_v38  ;;  %3410 = vmatmul.mubr.bf16.gmra.mrb[64].mxu1 %v335_v44 }
  0xfb   : > { %712 = vmatprep.mubr.bf16.mxu0 %v3759_v0  ;;  %3413 = vmatprep.mubr.bf16.mxu1 %v336_v45 }
 0x102   : > { %713 = vmatmul.mubr.bf16.gmra.mrb[68].mxu0 %v335_v44  ;;  %3414 = vmatmul.mubr.bf16.gmra.mrb[68].mxu1 %v337_v51 }
 0x103   : > { %722 = vmatprep.mubr.bf16.mxu0 %v3759_v0  ;;  %3417 = vmatprep.mubr.bf16.mxu1 %v338_v52 }
 0x10a   : > { %723 = vmatmul.mubr.bf16.gmra.mrb[72].mxu0 %v336_v45  ;;  %3418 = vmatmul.mubr.bf16.gmra.mrb[72].mxu1 %v339_v58 }
 0x10b   : > { %732 = vmatprep.mubr.bf16.mxu0 %v3759_v0  ;;  %3421 = vmatprep.mubr.bf16.mxu1 %v340_v59 }
 0x112   : > { %733 = vmatmul.mubr.bf16.gmra.mrb[76].mxu0 %v337_v51  ;;  %3422 = vmatmul.mubr.bf16.gmra.mrb[76].mxu1 %v341_v63 }
 0x113   : > { %742 = vmatprep.mubr.bf16.mxu0 %v3759_v0  ;;  %3425 = vmatprep.mubr.bf16.mxu1 %v3953_v23 }
 0x11a   : > { %743 = vmatmul.mubr.bf16.gmra.mrb[80].mxu0 %v338_v52  ;;  %3426 = vmatmul.mubr.bf16.gmra.mrb[80].mxu1 %v3965_v31 }
 0x11b   : > { %752 = vmatprep.mubr.bf16.mxu0 %v3759_v0  ;;  %3429 = vmatprep.mubr.bf16.mxu1 %v3977_v39 }
 0x122   : > { %753 = vmatmul.mubr.bf16.gmra.mrb[84].mxu0 %v339_v58  ;;  %3430 = vmatmul.mubr.bf16.gmra.mrb[84].mxu1 %v3987_v47 }
 0x123   : > { %762 = vmatprep.mubr.bf16.mxu0 %v3759_v0  ;;  %3433 = vmatprep.mubr.bf16.mxu1 %v3996_v54 }
 0x12a   : > { %763 = vmatmul.mubr.bf16.gmra.mrb[88].mxu0 %v340_v59  ;;  %3434 = vmatmul.mubr.bf16.gmra.mrb[88].mxu1 %v4005_v60 }
 0x12b   : > { %772 = vmatprep.mubr.bf16.mxu0 %v3759_v0  ;;  %3437 = vmatprep.mubr.bf16.mxu1 %v4014_v3 }
 0x132   : > { %773 = vmatmul.mubr.bf16.gmra.mrb[92].mxu0 %v341_v63  ;;  %3438 = vmatmul.mubr.bf16.gmra.mrb[92].mxu1 %v4023_v9 }
 0x14d   : > { %v544_v23 = vpop.f32.mrb[0].mxu0  ;;  %v784_v31 = vpop.f32.mrb[0].mxu1 }
 0x14e   : > { %v546_v39 = vpop.f32.mrb[1].mxu0  ;;  %v786_v47 = vpop.f32.mrb[1].mxu1 }
 0x14f   : > { %v548_v1 = vpop.f32.mrb[2].mxu0  ;;  %v788_v54 = vpop.f32.mrb[2].mxu1 }
 0x150   : > { %v2751_v2 = vpack.c.bf16 %v548_v1, %v544_v23  ;;  %v2871_v4 = vpack.c.bf16 %v788_v54, %v784_v31  ;;  %v550_v60 = vpop.f32.mrb[3].mxu0  ;;  %v790_v5 = vpop.f32.mrb[3].mxu1 }
 0x151   : > { %v2911_v0 = vpack.c.bf16 %v550_v60, %v546_v39  ;;  %v3031_v6 = vpack.c.bf16 %v790_v5, %v786_v47 }
 0x152   : > { %2752 = vst [vmem:[%s4089_s23] sm:$0xff] %v2751_v2   ;;  %3251 = vst [vmem:[%s4089_s23 + $0xc0] sm:$0xff] %v2871_v4  }
 0x153   : > { %2912 = vst [vmem:[%s4094_s10] sm:$0xff] %v2911_v0   ;;  %3282 = vst [vmem:[%s4094_s10 + $0xc0] sm:$0xff] %v3031_v6  }
 0x155   : > { %v554_v3 = vpop.f32.mrb[4].mxu0  ;;  %v794_v7 = vpop.f32.mrb[4].mxu1 }
 0x156   : > { %v556_v8 = vpop.f32.mrb[5].mxu0  ;;  %v796_v9 = vpop.f32.mrb[5].mxu1 }
 0x157   : > { %v558_v10 = vpop.f32.mrb[6].mxu0  ;;  %v798_v11 = vpop.f32.mrb[6].mxu1 }
 0x158   : > { %v2756_v12 = vpack.c.bf16 %v558_v10, %v554_v3  ;;  %v2876_v13 = vpack.c.bf16 %v798_v11, %v794_v7  ;;  %v560_v14 = vpop.f32.mrb[7].mxu0  ;;  %v800_v15 = vpop.f32.mrb[7].mxu1 }
 0x159   : > { %v2916_v16 = vpack.c.bf16 %v560_v14, %v556_v8  ;;  %v3036_v17 = vpack.c.bf16 %v800_v15, %v796_v9 }
 0x15a   : > { %3228 = vst [vmem:[%s4089_s23 + $0x8] sm:$0xff] %v2756_v12   ;;  %3252 = vst [vmem:[%s4089_s23 + $0xc8] sm:$0xff] %v2876_v13  }
 0x15b   : > { %3259 = vst [vmem:[%s4094_s10 + $0x8] sm:$0xff] %v2916_v16   ;;  %3283 = vst [vmem:[%s4094_s10 + $0xc8] sm:$0xff] %v3036_v17  }
 0x15d   : > { %v564_v18 = vpop.f32.mrb[8].mxu0  ;;  %v804_v19 = vpop.f32.mrb[8].mxu1 }
 0x15e   : > { %v566_v20 = vpop.f32.mrb[9].mxu0  ;;  %v806_v21 = vpop.f32.mrb[9].mxu1 }
 0x15f   : > { %v568_v22 = vpop.f32.mrb[10].mxu0  ;;  %v808_v24 = vpop.f32.mrb[10].mxu1 }
 0x160   : > { %v2761_v25 = vpack.c.bf16 %v568_v22, %v564_v18  ;;  %v2881_v26 = vpack.c.bf16 %v808_v24, %v804_v19  ;;  %v570_v27 = vpop.f32.mrb[11].mxu0  ;;  %v810_v28 = vpop.f32.mrb[11].mxu1 }
 0x161   : > { %v2921_v29 = vpack.c.bf16 %v570_v27, %v566_v20  ;;  %v3041_v30 = vpack.c.bf16 %v810_v28, %v806_v21 }
 0x162   : > { %3229 = vst [vmem:[%s4089_s23 + $0x10] sm:$0xff] %v2761_v25   ;;  %3253 = vst [vmem:[%s4089_s23 + $0xd0] sm:$0xff] %v2881_v26  }
 0x163   : > { %3260 = vst [vmem:[%s4094_s10 + $0x10] sm:$0xff] %v2921_v29   ;;  %3284 = vst [vmem:[%s4094_s10 + $0xd0] sm:$0xff] %v3041_v30  }
 0x165   : > { %v574_v32 = vpop.f32.mrb[12].mxu0  ;;  %v814_v33 = vpop.f32.mrb[12].mxu1 }
 0x166   : > { %v576_v34 = vpop.f32.mrb[13].mxu0  ;;  %v816_v35 = vpop.f32.mrb[13].mxu1 }
 0x167   : > { %v578_v36 = vpop.f32.mrb[14].mxu0  ;;  %v818_v37 = vpop.f32.mrb[14].mxu1 }
 0x168   : > { %v2766_v38 = vpack.c.bf16 %v578_v36, %v574_v32  ;;  %v2886_v40 = vpack.c.bf16 %v818_v37, %v814_v33  ;;  %v580_v41 = vpop.f32.mrb[15].mxu0  ;;  %v820_v42 = vpop.f32.mrb[15].mxu1 }
 0x169   : > { %v2926_v43 = vpack.c.bf16 %v580_v41, %v576_v34  ;;  %v3046_v44 = vpack.c.bf16 %v820_v42, %v816_v35 }
 0x16a   : > { %3230 = vst [vmem:[%s4089_s23 + $0x18] sm:$0xff] %v2766_v38   ;;  %3254 = vst [vmem:[%s4089_s23 + $0xd8] sm:$0xff] %v2886_v40  }
 0x16b   : > { %3261 = vst [vmem:[%s4094_s10 + $0x18] sm:$0xff] %v2926_v43   ;;  %3285 = vst [vmem:[%s4094_s10 + $0xd8] sm:$0xff] %v3046_v44  }
 0x16d   : > { %v584_v45 = vpop.f32.mrb[16].mxu0  ;;  %v824_v46 = vpop.f32.mrb[16].mxu1 }
 0x16e   : > { %v586_v48 = vpop.f32.mrb[17].mxu0  ;;  %v826_v49 = vpop.f32.mrb[17].mxu1 }
 0x16f   : > { %v588_v50 = vpop.f32.mrb[18].mxu0  ;;  %v828_v51 = vpop.f32.mrb[18].mxu1 }
 0x170   : > { %v2771_v52 = vpack.c.bf16 %v588_v50, %v584_v45  ;;  %v2891_v53 = vpack.c.bf16 %v828_v51, %v824_v46  ;;  %v590_v55 = vpop.f32.mrb[19].mxu0  ;;  %v830_v56 = vpop.f32.mrb[19].mxu1 }
 0x171   : > { %v2931_v57 = vpack.c.bf16 %v590_v55, %v586_v48  ;;  %v3051_v58 = vpack.c.bf16 %v830_v56, %v826_v49 }
 0x172   : > { %3231 = vst [vmem:[%s4089_s23 + $0x20] sm:$0xff] %v2771_v52   ;;  %3255 = vst [vmem:[%s4089_s23 + $0xe0] sm:$0xff] %v2891_v53  }
 0x173   : > { %3262 = vst [vmem:[%s4094_s10 + $0x20] sm:$0xff] %v2931_v57   ;;  %3286 = vst [vmem:[%s4094_s10 + $0xe0] sm:$0xff] %v3051_v58  }
 0x175   : > { %v594_v59 = vpop.f32.mrb[20].mxu0  ;;  %v834_v61 = vpop.f32.mrb[20].mxu1 }
 0x176   : > { %v596_v62 = vpop.f32.mrb[21].mxu0  ;;  %v836_v63 = vpop.f32.mrb[21].mxu1 }
 0x177   : > { %v598_v23 = vpop.f32.mrb[22].mxu0  ;;  %v838_v31 = vpop.f32.mrb[22].mxu1 }
 0x178   : > { %v2776_v39 = vpack.c.bf16 %v598_v23, %v594_v59  ;;  %v2896_v47 = vpack.c.bf16 %v838_v31, %v834_v61  ;;  %v600_v1 = vpop.f32.mrb[23].mxu0  ;;  %v840_v54 = vpop.f32.mrb[23].mxu1 }
 0x179   : > { %v2936_v2 = vpack.c.bf16 %v600_v1, %v596_v62  ;;  %v3056_v4 = vpack.c.bf16 %v840_v54, %v836_v63 }
 0x17a   : > { %3232 = vst [vmem:[%s4089_s23 + $0x28] sm:$0xff] %v2776_v39   ;;  %3256 = vst [vmem:[%s4089_s23 + $0xe8] sm:$0xff] %v2896_v47  }
 0x17b   : > { %3263 = vst [vmem:[%s4094_s10 + $0x28] sm:$0xff] %v2936_v2   ;;  %3287 = vst [vmem:[%s4094_s10 + $0xe8] sm:$0xff] %v3056_v4  }
 0x17d   : > { %v604_v60 = vpop.f32.mrb[24].mxu0  ;;  %v844_v5 = vpop.f32.mrb[24].mxu1 }
 0x17e   : > { %v606_v0 = vpop.f32.mrb[25].mxu0  ;;  %v846_v6 = vpop.f32.mrb[25].mxu1 }
 0x17f   : > { %v608_v3 = vpop.f32.mrb[26].mxu0  ;;  %v848_v7 = vpop.f32.mrb[26].mxu1 }
 0x180   : > { %v2781_v8 = vpack.c.bf16 %v608_v3, %v604_v60  ;;  %v2901_v9 = vpack.c.bf16 %v848_v7, %v844_v5  ;;  %v610_v10 = vpop.f32.mrb[27].mxu0  ;;  %v850_v11 = vpop.f32.mrb[27].mxu1 }
 0x181   : > { %v2941_v12 = vpack.c.bf16 %v610_v10, %v606_v0  ;;  %v3061_v13 = vpack.c.bf16 %v850_v11, %v846_v6 }
 0x182   : > { %3233 = vst [vmem:[%s4089_s23 + $0x30] sm:$0xff] %v2781_v8   ;;  %3257 = vst [vmem:[%s4089_s23 + $0xf0] sm:$0xff] %v2901_v9  }
 0x183   : > { %3264 = vst [vmem:[%s4094_s10 + $0x30] sm:$0xff] %v2941_v12   ;;  %3288 = vst [vmem:[%s4094_s10 + $0xf0] sm:$0xff] %v3061_v13  }
 0x185   : > { %v614_v14 = vpop.f32.mrb[28].mxu0  ;;  %v854_v15 = vpop.f32.mrb[28].mxu1 }
 0x186   : > { %v616_v16 = vpop.f32.mrb[29].mxu0  ;;  %v856_v17 = vpop.f32.mrb[29].mxu1 }
 0x187   : > { %v618_v18 = vpop.f32.mrb[30].mxu0  ;;  %v858_v19 = vpop.f32.mrb[30].mxu1 }
 0x188   : > { %v2786_v20 = vpack.c.bf16 %v618_v18, %v614_v14  ;;  %v2906_v21 = vpack.c.bf16 %v858_v19, %v854_v15  ;;  %v620_v22 = vpop.f32.mrb[31].mxu0  ;;  %v860_v24 = vpop.f32.mrb[31].mxu1 }
 0x189   : > { %v2946_v25 = vpack.c.bf16 %v620_v22, %v616_v16  ;;  %v3066_v26 = vpack.c.bf16 %v860_v24, %v856_v17 }
 0x18a   : > { %3234 = vst [vmem:[%s4089_s23 + $0x38] sm:$0xff] %v2786_v20   ;;  %3258 = vst [vmem:[%s4089_s23 + $0xf8] sm:$0xff] %v2906_v21  }
 0x18b   : > { %3265 = vst [vmem:[%s4094_s10 + $0x38] sm:$0xff] %v2946_v25   ;;  %3289 = vst [vmem:[%s4094_s10 + $0xf8] sm:$0xff] %v3066_v26  }
 0x18d   : > { %v624_v27 = vpop.f32.mrb[32].mxu0  ;;  %v3379_v28 = vpop.f32.mrb[32].mxu1 }
 0x18e   : > { %v626_v29 = vpop.f32.mrb[33].mxu0  ;;  %v897_v30 = vpop.f32.mrb[33].mxu1 }
 0x18f   : > { %v628_v32 = vpop.f32.mrb[34].mxu0  ;;  %v3380_v33 = vpop.f32.mrb[34].mxu1 }
 0x190   : > { %v2791_v34 = vpack.c.bf16 %v628_v32, %v624_v27  ;;  %v3076_v35 = vpack.c.bf16 %v3380_v33, %v3379_v28  ;;  %v630_v36 = vpop.f32.mrb[35].mxu0  ;;  %v900_v37 = vpop.f32.mrb[35].mxu1 }
 0x191   : > { %v2951_v38 = vpack.c.bf16 %v630_v36, %v626_v29  ;;  %v3071_v40 = vpack.c.bf16 %v900_v37, %v897_v30 }
 0x192   : > { %3235 = vst [vmem:[%s4089_s23 + $0x40] sm:$0xff] %v2791_v34   ;;  %3290 = vst [vmem:[%s4128_s28 + $0x8] sm:$0xff] %v3076_v35  }
 0x193   : > { %3266 = vst [vmem:[%s4094_s10 + $0x40] sm:$0xff] %v2951_v38   ;;  %3072 = vst [vmem:[%s4128_s28] sm:$0xff] %v3071_v40  }
 0x195   : > { %v634_v41 = vpop.f32.mrb[36].mxu0  ;;  %v3383_v42 = vpop.f32.mrb[36].mxu1 }
 0x196   : > { %v636_v43 = vpop.f32.mrb[37].mxu0  ;;  %v913_v44 = vpop.f32.mrb[37].mxu1 }
 0x197   : > { %v638_v45 = vpop.f32.mrb[38].mxu0  ;;  %v3384_v46 = vpop.f32.mrb[38].mxu1 }
 0x198   : > { %v2796_v48 = vpack.c.bf16 %v638_v45, %v634_v41  ;;  %v3086_v49 = vpack.c.bf16 %v3384_v46, %v3383_v42  ;;  %v640_v50 = vpop.f32.mrb[39].mxu0  ;;  %v916_v51 = vpop.f32.mrb[39].mxu1 }
 0x199   : > { %v2956_v52 = vpack.c.bf16 %v640_v50, %v636_v43  ;;  %v3081_v53 = vpack.c.bf16 %v916_v51, %v913_v44 }
 0x19a   : > { %3236 = vst [vmem:[%s4089_s23 + $0x48] sm:$0xff] %v2796_v48   ;;  %3292 = vst [vmem:[%s4128_s28 + $0x18] sm:$0xff] %v3086_v49  }
 0x19b   : > { %3267 = vst [vmem:[%s4094_s10 + $0x48] sm:$0xff] %v2956_v52   ;;  %3291 = vst [vmem:[%s4128_s28 + $0x10] sm:$0xff] %v3081_v53  }
 0x19d   : > { %v644_v55 = vpop.f32.mrb[40].mxu0  ;;  %v3387_v56 = vpop.f32.mrb[40].mxu1 }
 0x19e   : > { %v646_v57 = vpop.f32.mrb[41].mxu0  ;;  %v929_v58 = vpop.f32.mrb[41].mxu1 }
 0x19f   : > { %v648_v59 = vpop.f32.mrb[42].mxu0  ;;  %v3388_v61 = vpop.f32.mrb[42].mxu1 }
 0x1a0   : > { %v2801_v62 = vpack.c.bf16 %v648_v59, %v644_v55  ;;  %v3096_v63 = vpack.c.bf16 %v3388_v61, %v3387_v56  ;;  %v650_v23 = vpop.f32.mrb[43].mxu0  ;;  %v932_v31 = vpop.f32.mrb[43].mxu1 }
 0x1a1   : > { %v2961_v39 = vpack.c.bf16 %v650_v23, %v646_v57  ;;  %v3091_v47 = vpack.c.bf16 %v932_v31, %v929_v58 }
 0x1a2   : > { %3237 = vst [vmem:[%s4089_s23 + $0x50] sm:$0xff] %v2801_v62   ;;  %3294 = vst [vmem:[%s4128_s28 + $0x28] sm:$0xff] %v3096_v63  }
 0x1a3   : > { %3268 = vst [vmem:[%s4094_s10 + $0x50] sm:$0xff] %v2961_v39   ;;  %3293 = vst [vmem:[%s4128_s28 + $0x20] sm:$0xff] %v3091_v47  }
 0x1a5   : > { %v654_v1 = vpop.f32.mrb[44].mxu0  ;;  %v3391_v54 = vpop.f32.mrb[44].mxu1 }
 0x1a6   : > { %v656_v2 = vpop.f32.mrb[45].mxu0  ;;  %v945_v4 = vpop.f32.mrb[45].mxu1 }
 0x1a7   : > { %v658_v60 = vpop.f32.mrb[46].mxu0  ;;  %v3392_v5 = vpop.f32.mrb[46].mxu1 }
 0x1a8   : > { %v2806_v0 = vpack.c.bf16 %v658_v60, %v654_v1  ;;  %v3106_v6 = vpack.c.bf16 %v3392_v5, %v3391_v54  ;;  %v660_v3 = vpop.f32.mrb[47].mxu0  ;;  %v948_v7 = vpop.f32.mrb[47].mxu1 }
 0x1a9   : > { %v2966_v8 = vpack.c.bf16 %v660_v3, %v656_v2  ;;  %v3101_v9 = vpack.c.bf16 %v948_v7, %v945_v4 }
 0x1aa   : > { %3238 = vst [vmem:[%s4089_s23 + $0x58] sm:$0xff] %v2806_v0   ;;  %3296 = vst [vmem:[%s4128_s28 + $0x38] sm:$0xff] %v3106_v6  }
 0x1ab   : > { %3269 = vst [vmem:[%s4094_s10 + $0x58] sm:$0xff] %v2966_v8   ;;  %3295 = vst [vmem:[%s4128_s28 + $0x30] sm:$0xff] %v3101_v9  }
 0x1ad   : > { %v664_v10 = vpop.f32.mrb[48].mxu0  ;;  %v3395_v11 = vpop.f32.mrb[48].mxu1 }
 0x1ae   : > { %v666_v12 = vpop.f32.mrb[49].mxu0  ;;  %v961_v13 = vpop.f32.mrb[49].mxu1 }
 0x1af   : > { %v668_v14 = vpop.f32.mrb[50].mxu0  ;;  %v3396_v15 = vpop.f32.mrb[50].mxu1 }
 0x1b0   : > { %v2811_v16 = vpack.c.bf16 %v668_v14, %v664_v10  ;;  %v3116_v17 = vpack.c.bf16 %v3396_v15, %v3395_v11  ;;  %v670_v18 = vpop.f32.mrb[51].mxu0  ;;  %v964_v19 = vpop.f32.mrb[51].mxu1 }
 0x1b1   : > { %v2971_v20 = vpack.c.bf16 %v670_v18, %v666_v12  ;;  %v3111_v21 = vpack.c.bf16 %v964_v19, %v961_v13 }
 0x1b2   : > { %3239 = vst [vmem:[%s4089_s23 + $0x60] sm:$0xff] %v2811_v16   ;;  %3298 = vst [vmem:[%s4128_s28 + $0x48] sm:$0xff] %v3116_v17  }
 0x1b3   : > { %3270 = vst [vmem:[%s4094_s10 + $0x60] sm:$0xff] %v2971_v20   ;;  %3297 = vst [vmem:[%s4128_s28 + $0x40] sm:$0xff] %v3111_v21  }
 0x1b5   : > { %v674_v22 = vpop.f32.mrb[52].mxu0  ;;  %v3399_v24 = vpop.f32.mrb[52].mxu1 }
 0x1b6   : > { %v676_v25 = vpop.f32.mrb[53].mxu0  ;;  %v977_v26 = vpop.f32.mrb[53].mxu1 }
 0x1b7   : > { %v678_v27 = vpop.f32.mrb[54].mxu0  ;;  %v3400_v28 = vpop.f32.mrb[54].mxu1 }
 0x1b8   : > { %v2816_v29 = vpack.c.bf16 %v678_v27, %v674_v22  ;;  %v3126_v30 = vpack.c.bf16 %v3400_v28, %v3399_v24  ;;  %v680_v32 = vpop.f32.mrb[55].mxu0  ;;  %v980_v33 = vpop.f32.mrb[55].mxu1 }
 0x1b9   : > { %v2976_v34 = vpack.c.bf16 %v680_v32, %v676_v25  ;;  %v3121_v35 = vpack.c.bf16 %v980_v33, %v977_v26 }
 0x1ba   : > { %3240 = vst [vmem:[%s4089_s23 + $0x68] sm:$0xff] %v2816_v29   ;;  %3300 = vst [vmem:[%s4128_s28 + $0x58] sm:$0xff] %v3126_v30  }
 0x1bb   : > { %3271 = vst [vmem:[%s4094_s10 + $0x68] sm:$0xff] %v2976_v34   ;;  %3299 = vst [vmem:[%s4128_s28 + $0x50] sm:$0xff] %v3121_v35  }
 0x1bd   : > { %v684_v36 = vpop.f32.mrb[56].mxu0  ;;  %v3403_v37 = vpop.f32.mrb[56].mxu1 }
 0x1be   : > { %v686_v38 = vpop.f32.mrb[57].mxu0  ;;  %v993_v40 = vpop.f32.mrb[57].mxu1 }
 0x1bf   : > { %v688_v41 = vpop.f32.mrb[58].mxu0  ;;  %v3404_v42 = vpop.f32.mrb[58].mxu1 }
 0x1c0   : > { %v2821_v43 = vpack.c.bf16 %v688_v41, %v684_v36  ;;  %v3136_v44 = vpack.c.bf16 %v3404_v42, %v3403_v37  ;;  %v690_v45 = vpop.f32.mrb[59].mxu0  ;;  %v996_v46 = vpop.f32.mrb[59].mxu1 }
 0x1c1   : > { %v2981_v48 = vpack.c.bf16 %v690_v45, %v686_v38  ;;  %v3131_v49 = vpack.c.bf16 %v996_v46, %v993_v40 }
 0x1c2   : > { %3241 = vst [vmem:[%s4089_s23 + $0x70] sm:$0xff] %v2821_v43   ;;  %3302 = vst [vmem:[%s4128_s28 + $0x68] sm:$0xff] %v3136_v44  }
 0x1c3   : > { %3272 = vst [vmem:[%s4094_s10 + $0x70] sm:$0xff] %v2981_v48   ;;  %3301 = vst [vmem:[%s4128_s28 + $0x60] sm:$0xff] %v3131_v49  }
 0x1c5   : > { %v694_v50 = vpop.f32.mrb[60].mxu0  ;;  %v3407_v51 = vpop.f32.mrb[60].mxu1 }
 0x1c6   : > { %v696_v52 = vpop.f32.mrb[61].mxu0  ;;  %v1009_v53 = vpop.f32.mrb[61].mxu1 }
 0x1c7   : > { %v698_v55 = vpop.f32.mrb[62].mxu0  ;;  %v3408_v56 = vpop.f32.mrb[62].mxu1 }
 0x1c8   : > { %v2826_v57 = vpack.c.bf16 %v698_v55, %v694_v50  ;;  %v3146_v58 = vpack.c.bf16 %v3408_v56, %v3407_v51  ;;  %v700_v59 = vpop.f32.mrb[63].mxu0  ;;  %v1012_v61 = vpop.f32.mrb[63].mxu1 }
 0x1c9   : > { %v2986_v62 = vpack.c.bf16 %v700_v59, %v696_v52  ;;  %v3141_v63 = vpack.c.bf16 %v1012_v61, %v1009_v53 }
 0x1ca   : > { %3242 = vst [vmem:[%s4089_s23 + $0x78] sm:$0xff] %v2826_v57   ;;  %3304 = vst [vmem:[%s4128_s28 + $0x78] sm:$0xff] %v3146_v58  }
 0x1cb   : > { %3273 = vst [vmem:[%s4094_s10 + $0x78] sm:$0xff] %v2986_v62   ;;  %3303 = vst [vmem:[%s4128_s28 + $0x70] sm:$0xff] %v3141_v63  }
 0x1cd   : > { %v704_v23 = vpop.f32.mrb[64].mxu0  ;;  %v3411_v31 = vpop.f32.mrb[64].mxu1 }
 0x1ce   : > { %v706_v39 = vpop.f32.mrb[65].mxu0  ;;  %v1025_v47 = vpop.f32.mrb[65].mxu1 }
 0x1cf   : > { %v708_v1 = vpop.f32.mrb[66].mxu0  ;;  %v3412_v54 = vpop.f32.mrb[66].mxu1 }
 0x1d0   : > { %v2831_v2 = vpack.c.bf16 %v708_v1, %v704_v23  ;;  %v3156_v4 = vpack.c.bf16 %v3412_v54, %v3411_v31  ;;  %v710_v60 = vpop.f32.mrb[67].mxu0  ;;  %v1028_v5 = vpop.f32.mrb[67].mxu1 }
 0x1d1   : > { %v2991_v0 = vpack.c.bf16 %v710_v60, %v706_v39  ;;  %v3151_v6 = vpack.c.bf16 %v1028_v5, %v1025_v47 }
 0x1d2   : > { %3243 = vst [vmem:[%s4089_s23 + $0x80] sm:$0xff] %v2831_v2   ;;  %3306 = vst [vmem:[%s4128_s28 + $0x88] sm:$0xff] %v3156_v4  }
 0x1d3   : > { %3274 = vst [vmem:[%s4094_s10 + $0x80] sm:$0xff] %v2991_v0   ;;  %3305 = vst [vmem:[%s4128_s28 + $0x80] sm:$0xff] %v3151_v6  }
 0x1d5   : > { %v714_v3 = vpop.f32.mrb[68].mxu0  ;;  %v3415_v7 = vpop.f32.mrb[68].mxu1 }
 0x1d6   : > { %v716_v8 = vpop.f32.mrb[69].mxu0  ;;  %v1041_v9 = vpop.f32.mrb[69].mxu1 }
 0x1d7   : > { %v718_v10 = vpop.f32.mrb[70].mxu0  ;;  %v3416_v11 = vpop.f32.mrb[70].mxu1 }
 0x1d8   : > { %v2836_v12 = vpack.c.bf16 %v718_v10, %v714_v3  ;;  %v3166_v13 = vpack.c.bf16 %v3416_v11, %v3415_v7  ;;  %v720_v14 = vpop.f32.mrb[71].mxu0  ;;  %v1044_v15 = vpop.f32.mrb[71].mxu1 }
 0x1d9   : > { %v2996_v16 = vpack.c.bf16 %v720_v14, %v716_v8  ;;  %v3161_v17 = vpack.c.bf16 %v1044_v15, %v1041_v9 }
 0x1da   : > { %3244 = vst [vmem:[%s4089_s23 + $0x88] sm:$0xff] %v2836_v12   ;;  %3308 = vst [vmem:[%s4128_s28 + $0x98] sm:$0xff] %v3166_v13  }
 0x1db   : > { %3275 = vst [vmem:[%s4094_s10 + $0x88] sm:$0xff] %v2996_v16   ;;  %3307 = vst [vmem:[%s4128_s28 + $0x90] sm:$0xff] %v3161_v17  }
 0x1dd   : > { %v724_v18 = vpop.f32.mrb[72].mxu0  ;;  %v3419_v19 = vpop.f32.mrb[72].mxu1 }
 0x1de   : > { %v726_v20 = vpop.f32.mrb[73].mxu0  ;;  %v1057_v21 = vpop.f32.mrb[73].mxu1 }
 0x1df   : > { %v728_v22 = vpop.f32.mrb[74].mxu0  ;;  %v3420_v24 = vpop.f32.mrb[74].mxu1 }
 0x1e0   : > { %v2841_v25 = vpack.c.bf16 %v728_v22, %v724_v18  ;;  %v3176_v26 = vpack.c.bf16 %v3420_v24, %v3419_v19  ;;  %v730_v27 = vpop.f32.mrb[75].mxu0  ;;  %v1060_v28 = vpop.f32.mrb[75].mxu1 }
 0x1e1   : > { %v3001_v29 = vpack.c.bf16 %v730_v27, %v726_v20  ;;  %v3171_v30 = vpack.c.bf16 %v1060_v28, %v1057_v21 }
 0x1e2   : > { %3245 = vst [vmem:[%s4089_s23 + $0x90] sm:$0xff] %v2841_v25   ;;  %3310 = vst [vmem:[%s4128_s28 + $0xa8] sm:$0xff] %v3176_v26  }
 0x1e3   : > { %3276 = vst [vmem:[%s4094_s10 + $0x90] sm:$0xff] %v3001_v29   ;;  %3309 = vst [vmem:[%s4128_s28 + $0xa0] sm:$0xff] %v3171_v30  }
 0x1e5   : > { %v734_v32 = vpop.f32.mrb[76].mxu0  ;;  %v3423_v33 = vpop.f32.mrb[76].mxu1 }
 0x1e6   : > { %v736_v34 = vpop.f32.mrb[77].mxu0  ;;  %v1073_v35 = vpop.f32.mrb[77].mxu1 }
 0x1e7   : > { %v738_v36 = vpop.f32.mrb[78].mxu0  ;;  %v3424_v37 = vpop.f32.mrb[78].mxu1 }
 0x1e8   : > { %v2846_v38 = vpack.c.bf16 %v738_v36, %v734_v32  ;;  %v3186_v40 = vpack.c.bf16 %v3424_v37, %v3423_v33  ;;  %v740_v41 = vpop.f32.mrb[79].mxu0  ;;  %v1076_v42 = vpop.f32.mrb[79].mxu1 }
 0x1e9   : > { %v3006_v43 = vpack.c.bf16 %v740_v41, %v736_v34  ;;  %v3181_v44 = vpack.c.bf16 %v1076_v42, %v1073_v35 }
 0x1ea   : > { %3246 = vst [vmem:[%s4089_s23 + $0x98] sm:$0xff] %v2846_v38   ;;  %3312 = vst [vmem:[%s4128_s28 + $0xb8] sm:$0xff] %v3186_v40  }
 0x1eb   : > { %3277 = vst [vmem:[%s4094_s10 + $0x98] sm:$0xff] %v3006_v43   ;;  %3311 = vst [vmem:[%s4128_s28 + $0xb0] sm:$0xff] %v3181_v44  }
 0x1ed   : > { %v744_v45 = vpop.f32.mrb[80].mxu0  ;;  %v3427_v46 = vpop.f32.mrb[80].mxu1 }
 0x1ee   : > { %v746_v48 = vpop.f32.mrb[81].mxu0  ;;  %v1089_v49 = vpop.f32.mrb[81].mxu1 }
 0x1ef   : > { %v748_v50 = vpop.f32.mrb[82].mxu0  ;;  %v3428_v51 = vpop.f32.mrb[82].mxu1 }
 0x1f0   : > { %v2851_v52 = vpack.c.bf16 %v748_v50, %v744_v45  ;;  %v3196_v53 = vpack.c.bf16 %v3428_v51, %v3427_v46  ;;  %v750_v55 = vpop.f32.mrb[83].mxu0  ;;  %v1092_v56 = vpop.f32.mrb[83].mxu1 }
 0x1f1   : > { %v3011_v57 = vpack.c.bf16 %v750_v55, %v746_v48  ;;  %v3191_v58 = vpack.c.bf16 %v1092_v56, %v1089_v49 }
 0x1f2   : > { %3247 = vst [vmem:[%s4089_s23 + $0xa0] sm:$0xff] %v2851_v52   ;;  %3314 = vst [vmem:[%s4128_s28 + $0xc8] sm:$0xff] %v3196_v53  }
 0x1f3   : > { %3278 = vst [vmem:[%s4094_s10 + $0xa0] sm:$0xff] %v3011_v57   ;;  %3313 = vst [vmem:[%s4128_s28 + $0xc0] sm:$0xff] %v3191_v58  }
 0x1f5   : > { %v754_v59 = vpop.f32.mrb[84].mxu0  ;;  %v3431_v61 = vpop.f32.mrb[84].mxu1 }
 0x1f6   : > { %v756_v62 = vpop.f32.mrb[85].mxu0  ;;  %v1105_v63 = vpop.f32.mrb[85].mxu1 }
 0x1f7   : > { %v758_v23 = vpop.f32.mrb[86].mxu0  ;;  %v3432_v31 = vpop.f32.mrb[86].mxu1 }
 0x1f8   : > { %v2856_v39 = vpack.c.bf16 %v758_v23, %v754_v59  ;;  %v3206_v47 = vpack.c.bf16 %v3432_v31, %v3431_v61  ;;  %v760_v1 = vpop.f32.mrb[87].mxu0  ;;  %v1108_v54 = vpop.f32.mrb[87].mxu1 }
 0x1f9   : > { %v3016_v2 = vpack.c.bf16 %v760_v1, %v756_v62  ;;  %v3201_v4 = vpack.c.bf16 %v1108_v54, %v1105_v63 }
 0x1fa   : > { %3248 = vst [vmem:[%s4089_s23 + $0xa8] sm:$0xff] %v2856_v39   ;;  %3316 = vst [vmem:[%s4128_s28 + $0xd8] sm:$0xff] %v3206_v47  }
 0x1fb   : > { %3279 = vst [vmem:[%s4094_s10 + $0xa8] sm:$0xff] %v3016_v2   ;;  %3315 = vst [vmem:[%s4128_s28 + $0xd0] sm:$0xff] %v3201_v4  }
 0x1fd   : > { %v764_v60 = vpop.f32.mrb[88].mxu0  ;;  %v3435_v5 = vpop.f32.mrb[88].mxu1 }
 0x1fe   : > { %v766_v0 = vpop.f32.mrb[89].mxu0  ;;  %v1121_v6 = vpop.f32.mrb[89].mxu1 }
 0x1ff   : > { %v768_v3 = vpop.f32.mrb[90].mxu0  ;;  %v3436_v7 = vpop.f32.mrb[90].mxu1 }
 0x200   : > { %v2861_v8 = vpack.c.bf16 %v768_v3, %v764_v60  ;;  %v3216_v9 = vpack.c.bf16 %v3436_v7, %v3435_v5  ;;  %v770_v10 = vpop.f32.mrb[91].mxu0  ;;  %v1124_v11 = vpop.f32.mrb[91].mxu1 }
 0x201   : > { %v3021_v12 = vpack.c.bf16 %v770_v10, %v766_v0  ;;  %v3211_v13 = vpack.c.bf16 %v1124_v11, %v1121_v6 }
 0x202   : > { %3249 = vst [vmem:[%s4089_s23 + $0xb0] sm:$0xff] %v2861_v8   ;;  %3318 = vst [vmem:[%s4128_s28 + $0xe8] sm:$0xff] %v3216_v9  }
 0x203   : > { %3280 = vst [vmem:[%s4094_s10 + $0xb0] sm:$0xff] %v3021_v12   ;;  %3317 = vst [vmem:[%s4128_s28 + $0xe0] sm:$0xff] %v3211_v13  }
 0x205   : > { %v774_v14 = vpop.f32.mrb[92].mxu0  ;;  %v3439_v15 = vpop.f32.mrb[92].mxu1 }
 0x206   : > { %v776_v16 = vpop.f32.mrb[93].mxu0  ;;  %v1137_v17 = vpop.f32.mrb[93].mxu1 }
 0x207   : > { %v778_v18 = vpop.f32.mrb[94].mxu0  ;;  %v3440_v19 = vpop.f32.mrb[94].mxu1 }
 0x208   : > { %v2866_v20 = vpack.c.bf16 %v778_v18, %v774_v14  ;;  %v3226_v21 = vpack.c.bf16 %v3440_v19, %v3439_v15  ;;  %v780_v22 = vpop.f32.mrb[95].mxu0  ;;  %v1140_v24 = vpop.f32.mrb[95].mxu1 }
 0x209   : > { %v3026_v25 = vpack.c.bf16 %v780_v22, %v776_v16  ;;  %v3221_v26 = vpack.c.bf16 %v1140_v24, %v1137_v17 }
 0x20a   : > { %3250 = vst [vmem:[%s4089_s23 + $0xb8] sm:$0xff] %v2866_v20   ;;  %3320 = vst [vmem:[%s4128_s28 + $0xf8] sm:$0xff] %v3226_v21   ;;  %s3627_s23 = scalar_lea.vmem %s3626_s7, 8192 }
 0x20b   : > { %3281 = vst [vmem:[%s4094_s10 + $0xb8] sm:$0xff] %v3026_v25   ;;  %3319 = vst [vmem:[%s4128_s28 + $0xf0] sm:$0xff] %v3221_v26   ;;  %p3629_p13 = scmp.lt.s32.totalorder %s3627_s23, %s3621_s29 }
 0x20d   : > { %p3630_p3 = por %p3629_p13, %p3628_p10 }
 0x20f   : > { %p3631_p7 = pnand %p3630_p3, %p3624_p8 }
 0x211   : > { %3634 = shalt.err (!%p3631_p7)
}
 0x212   : > { %s3635_s10 = scalar_lea.hbm %s4197_s13, 4096  ;;  %s3639_s21 = scalar_lea.hbm %s4322_s2, 8192 }
 0x213   : > { %p3636_p9 = scmp.ne.s32.totalorder %s4197_s13, %s3635_s10  ;;  %p3640_p5 = scmp.lt.u32.totalorder %s4197_s13, %s4322_s2 }
 0x214   : > { %p3641_p11 = scmp.lt.u32.totalorder %s3639_s21, %s3635_s10  ;;  %p3643_p4 = scmp.lt.u32.totalorder %s3635_s10, %s4197_s13 }
 0x215   : > { %p3637_p2 = pnand %p3636_p9, %p3883_p12 }
 0x216   : > { %p3642_p1 = por %p3641_p11, %p3640_p5 }
 0x217   : > { %p3638_p0 = pneg %p3637_p2 }
 0x218   : > { %p3644_p6 = por %p3643_p4, %p3642_p1 }
 0x21a   : > { %p3645_p8 = pnand %p3644_p6, %p3638_p0 }
 0x21c   : > { %3648 = shalt.err (!%p3645_p8)
}
 0x21d   : > { %s3761_s29 = smov 64   ;;  %s3762_s7 = smov 4  }
 0x21e   : > { %3463 = dma.vmem_to_hbm [thread:$0]  (%p3883_p12), %s4199_s6, 4096, %s4197_s13, %s2113_s20, %s3761_s29, %s3761_s29, %s3762_s7  }
 0x21f   : > { %s4340_s23 = sand.u32 1, %s3811_s19   ;;  %s3649_s28 = scalar_lea.vmem %s4206_s26, 4096 }
 0x220   : > { %s4248_s10 = scalar_lea.sflag [#allocation9], %s4340_s23  ;;  %p3650_p10 = scmp.ne.s32.totalorder %s4206_s26, %s3649_s28 }
 0x221   : > { %s3763_s11 = smov [#allocation8]  }
 0x222   : > { %p3651_p13 = pnand %p3650_p10, %p3883_p12  ;;  %s3653_s21 = sshll.u32 %s3763_s11, 4  ;;  %s3654_s21 = int_to_ptr.vmem [resolvable:$false] %s3653_s21 }
 0x223   : > { %s3655_s25 = scalar_lea.vmem %s3654_s21, 8192  ;;  %p3656_p7 = scmp.lt.s32.totalorder %s4206_s26, %s3654_s21 }
 0x224   : > { %p3652_p3 = pneg %p3651_p13  ;;  %p3657_p9 = scmp.lt.s32.totalorder %s3655_s25, %s3649_s28 }
 0x226   : > { %p3658_p2 = por %p3657_p9, %p3656_p7 }
 0x228   : > { %p3659_p0 = pnand %p3658_p2, %p3652_p3 }
 0x22a   : > { %3662 = shalt.err (!%p3659_p0)
}
 0x22b   : > { %s3663_s19 = scalar_lea.hbm %s4204_s8, 4096  ;;  %s3667_s6 = scalar_lea.hbm %s4323_s3, 8192 }
 0x22c   : > { %p3664_p5 = scmp.ne.s32.totalorder %s4204_s8, %s3663_s19  ;;  %p3668_p4 = scmp.lt.u32.totalorder %s4204_s8, %s4323_s3 }
 0x22d   : > { %p3669_p6 = scmp.lt.u32.totalorder %s3667_s6, %s3663_s19  ;;  %p3671_p10 = scmp.lt.u32.totalorder %s3663_s19, %s4204_s8 }
 0x22e   : > { %p3665_p11 = pnand %p3664_p5, %p3883_p12 }
 0x22f   : > { %p3670_p8 = por %p3669_p6, %p3668_p4 }
 0x230   : > { %p3666_p1 = pneg %p3665_p11 }
 0x231   : > { %p3672_p13 = por %p3671_p10, %p3670_p8 }
 0x233   : > { %p3673_p3 = pnand %p3672_p13, %p3666_p1 }
 0x235   : > { %3676 = shalt.err (!%p3673_p3)
}
 0x236   : > { %3464 = dma.vmem_to_hbm [thread:$0]  (%p3883_p12), %s4206_s26, 4096, %s4204_s8, %s4248_s10, %s3761_s29, %s3761_s29, %s3762_s7  }
 0x237   : > { %s3677_s23 = scalar_lea.vmem %s4215_s9, 4096  ;;  %s3764_s28 = smov [#allocation10]  }
 0x238   : > { %p3678_p7 = scmp.ne.s32.totalorder %s4215_s9, %s3677_s23  ;;  %s3681_s11 = sshll.u32 %s3764_s28, 4  ;;  %s3682_s11 = int_to_ptr.vmem [resolvable:$false] %s3681_s11 }
 0x239   : > { %s3683_s21 = scalar_lea.vmem %s3682_s11, 8192  ;;  %p3684_p0 = scmp.lt.s32.totalorder %s4215_s9, %s3682_s11 }
 0x23a   : > { %p3679_p9 = pnand %p3678_p7, %p3883_p12  ;;  %p3685_p5 = scmp.lt.s32.totalorder %s3683_s21, %s3677_s23 }
 0x23c   : > { %p3680_p2 = pneg %p3679_p9  ;;  %p3686_p11 = por %p3685_p5, %p3684_p0 }
 0x23e   : > { %p3687_p1 = pnand %p3686_p11, %p3680_p2 }
 0x240   : > { %3690 = shalt.err (!%p3687_p1)
}
 0x241   : > { %s3691_s26 = scalar_lea.hbm %s4213_s12, 4096  ;;  %s3695_s19 = scalar_lea.hbm %s4324_s4, 8192 }
 0x242   : > { %p3692_p4 = scmp.ne.s32.totalorder %s4213_s12, %s3691_s26  ;;  %p3696_p10 = scmp.lt.u32.totalorder %s4213_s12, %s4324_s4 }
 0x243   : > { %p3697_p13 = scmp.lt.u32.totalorder %s3695_s19, %s3691_s26  ;;  %p3699_p7 = scmp.lt.u32.totalorder %s3691_s26, %s4213_s12 }
 0x244   : > { %p3693_p6 = pnand %p3692_p4, %p3883_p12 }
 0x245   : > { %p3698_p3 = por %p3697_p13, %p3696_p10 }
 0x246   : > { %p3694_p8 = pneg %p3693_p6 }
 0x247   : > { %p3700_p9 = por %p3699_p7, %p3698_p3 }
 0x249   : > { %p3701_p2 = pnand %p3700_p9, %p3694_p8 }
 0x24b   : > { %3704 = shalt.err (!%p3701_p2)
}
 0x24c   : > { %3465 = dma.vmem_to_hbm [thread:$0]  (%p3883_p12), %s4215_s9, 4096, %s4213_s12, %s4248_s10, %s3761_s29, %s3761_s29, %s3762_s7  }
 0x24d PF: > { %s2183_s6 = sand.u32 1, %s3739_s15   ;;  %p4341_p0 = scmp.ne.s32.totalorder %s4330_s22, 0 }
 0x24e   : > { %p4342_p5 = scmp.ge.s32.totalorder %s3751_s18, 2  ;;  %s2184_s13 = scalar_lea.sflag [#allocation4], %s2183_s6 }
 0x250   : > { %p3478_p11 = pnand %p4342_p5, %p4341_p0 }
 0x252   : > { %3730 = dma.done.wait (!%p3478_p11), %s2184_s13, 4096  }
 0x253   : > { %3732 = vsyncadd (!%p3478_p11), %s2184_s13, 4294963200  ;;  %s4343_s5 = sadd.s32 4294967294, %s3751_s18  }
 0x254   : > { %s2192_s24 = sand.u32 1, %s4343_s5  }
 0x255   : > { %s2193_s23 = scalar_lea.sflag [#allocation9], %s2192_s24 }
 0x256   : > { %3734 = dma.done.wait (!%p3478_p11), %s2193_s23, 8192  }
 0x257   : > { %3736 = vsyncadd (!%p3478_p11), %s2193_s23, 4294959104  ;;  %p22_p12 = scmp.ge.s32.totalorder %s3848_s27, 4   ;;  %s4344_s15 = smov %s3743_s16 }
 0x258   : > { %s4345_s16 = smov %s3747_s17  ;;  %s4346_s17 = smov %s3879_s30 }
 0x259   : > { %s4347_s18 = smov %s3848_s27  ;;  %24 = sbr.rel (!%p22_p12) target bundleno = 8 (0x8), region = 109 }
 0x260   :  { %2207 = vsyncpa [#allocation3], 1 }
 0x261   :  { %2209 = vsyncpa [#allocation3 + $0x1], 1 }
 0x262   :  { %2210 = vsyncpa [#allocation6], 1 }
 0x263   :  { %2211 = vsyncpa [#allocation4], 1 }
 0x264   :  { %2213 = vsyncpa [#allocation4 + $0x1], 1 }
 0x265   :  { %2214 = vsyncpa [#allocation9], 1 }
 0x266   :  { %2216 = vsyncpa [#allocation9 + $0x1], 1 }

</bundles_post_ra>
